<compile_context>
chip_gen: v7x
topology: tpu7x:2x2x1
jax: 0.10.0
libtpu: 0.0.40
codegen_flags: <defaults>
</compile_context>

<pallas_src>
import functools
import math

import jax
import jax.numpy as jnp
from jax.experimental import pallas as pl
from jax.experimental.pallas import tpu as pltpu


def _pos_embed_kernel(tok_ref, pe_ref, table_ref, out_ref, rows_ref, sems,
                      *, tm, scale):
    # tok_ref:   [N_pad]        int32, SMEM (scalar prefetch) — token ids
    # pe_ref:    [tm, D_pad]    f32, VMEM tile (auto-pipelined) — PE rows for this tile
    # table_ref: [V, D_pad]     f32, HBM (pl.ANY) — embedding table, streamed via DMA
    # out_ref:   [tm, D_pad]    f32, VMEM output tile (lane-dense)
    # rows_ref:  [tm, D_pad]    f32, VMEM scratch for gathered rows
    # sems:      (tm,)          DMA semaphores, one per gathered row
    t = pl.program_id(0)
    base = t * tm

    # Issue all TM row gathers (concurrent DMAs; addressing comes from SMEM).
    for r in range(tm):
        tok = tok_ref[base + r]
        pltpu.make_async_copy(
            table_ref.at[pl.ds(tok, 1)],
            rows_ref.at[pl.ds(r, 1)],
            sems.at[r],
        ).start()

    # Wait for all of them (descriptor shape/sem is what matters for the wait).
    for r in range(tm):
        pltpu.make_async_copy(
            table_ref.at[pl.ds(0, 1)],
            rows_ref.at[pl.ds(r, 1)],
            sems.at[r],
        ).wait()

    # Scale + positional-encoding add (VPU), dense (tm, D_pad) store.
    out_ref[...] = rows_ref[...] * jnp.float32(scale) + pe_ref[...]


def make_positional_encoding(max_len: int, embed_dim: int) -> jnp.ndarray:
    """Sinusoidal PE table, shape [max_len, embed_dim] (batch dim squeezed)."""
    position = jnp.arange(max_len, dtype=jnp.float32)[:, None]                  # [L, 1]
    div_term = jnp.exp(
        jnp.arange(0, embed_dim, 2, dtype=jnp.float32)
        * (-math.log(10000.0) / embed_dim)
    )                                                                            # [D/2]
    pe = jnp.zeros((max_len, embed_dim), dtype=jnp.float32)
    pe = pe.at[:, 0::2].set(jnp.sin(position * div_term))
    pe = pe.at[:, 1::2].set(jnp.cos(position * div_term))
    return pe


def positional_embedding(tokens, emb_table, pe_full, *, tile_rows: int = 32):
    """tokens: [S, B] int32; emb_table: [V, D] f32; pe_full: [max_len, D] f32.

    Returns [S, B, D] f32 = emb_table[tokens] * sqrt(D) + pe_full[:S][:, None, :].
    """
    S, B = tokens.shape
    V, D = emb_table.shape
    n = S * B
    scale = math.sqrt(D)

    # Lane-dense layout: pad D up to a multiple of 128.
    d_pad = ((D + 127) // 128) * 128
    if d_pad != D:
        emb_table = jnp.pad(emb_table, ((0, 0), (0, d_pad - D)))
        pe_seq = jnp.pad(pe_full[:S], ((0, 0), (0, d_pad - D)))
    else:
        pe_seq = pe_full[:S]

    # Row-tile size (multiple of 8 sublanes); pad N up to a multiple of it.
    tm = max(8, 8 * (min(tile_rows, n) // 8))
    n_pad = ((n + tm - 1) // tm) * tm

    # Token ids → flat int32, clamped (a raw gather would read arbitrary rows
    # for OOB ids, unlike PyTorch which raises), padded to n_pad.
    tok_flat = jnp.clip(tokens.reshape(n), 0, V - 1).astype(jnp.int32)
    if n_pad != n:
        tok_flat = jnp.pad(tok_flat, (0, n_pad - n))

    # PE expanded to one row per flattened (s, b) token so it tiles with the
    # output (plain-JAX glue; modest extra HBM read, keeps the kernel simple).
    pe_rows = jnp.broadcast_to(pe_seq[:, None, :], (S, B, d_pad)).reshape(n, d_pad)
    if n_pad != n:
        pe_rows = jnp.pad(pe_rows, ((0, n_pad - n), (0, 0)))

    grid = (n_pad // tm,)
    grid_spec = pltpu.PrefetchScalarGridSpec(
        num_scalar_prefetch=1,                       # token ids → SMEM
        grid=grid,
        in_specs=[
            pl.BlockSpec((tm, d_pad), lambda t, tok: (t, 0)),   # PE rows (pipelined)
            pl.BlockSpec(memory_space=pl.ANY),                  # table stays in HBM
        ],
        out_specs=pl.BlockSpec((tm, d_pad), lambda t, tok: (t, 0)),
        scratch_shapes=[
            pltpu.VMEM((tm, d_pad), jnp.float32),               # gathered rows
            pltpu.SemaphoreType.DMA((tm,)),                     # one sem per row DMA
        ],
    )

    out_flat = pl.pallas_call(
        functools.partial(_pos_embed_kernel, tm=tm, scale=scale),
        out_shape=jax.ShapeDtypeStruct((n_pad, d_pad), jnp.float32),
        grid_spec=grid_spec,
        compiler_params=pltpu.CompilerParams(
            dimension_semantics=("parallel",),       # v7x: split tiles across 2 TCs
            vmem_limit_bytes=32 * 1024 * 1024,
        ),
    )(tok_flat, pe_rows, emb_table)

    return out_flat[:n, :D].reshape(S, B, D)


def positional_embedding_ref(tokens, emb_table, pe_full):
    """Pure-JAX reference matching the PyTorch forward (eval mode)."""
    D = emb_table.shape[1]
    x = emb_table[tokens] * math.sqrt(D)            # [S, B, D]
    x = x + pe_full[: tokens.shape[0]][:, None, :]
    return x


if __name__ == "__main__":
    # Small, forward-consistent shapes. D=32 exercises the pad-to-128 lane path.
    seq_len, batch, vocab_size, embed_dim, max_len = 8, 2, 64, 32, 64

    key = jax.random.PRNGKey(0)
    k_tok, k_emb = jax.random.split(key)

    tokens = jax.random.randint(k_tok, (seq_len, batch), 0, vocab_size, dtype=jnp.int32)
    # Deterministic synthetic init of nn.Embedding(vocab_size, embed_dim) weights.
    emb_table = jax.random.normal(k_emb, (vocab_size, embed_dim), dtype=jnp.float32)
    pe_full = make_positional_encoding(max_len, embed_dim)

    out = positional_embedding(tokens, emb_table, pe_full)
    out = jax.block_until_ready(out)

    ref = positional_embedding_ref(tokens, emb_table, pe_full)
    assert out.shape == (seq_len, batch, embed_dim)
    assert jnp.allclose(out, ref, atol=1e-5, rtol=1e-5)

    print("KERNEL_OK")
</pallas_src>

<mosaic_0001>
module attributes {stable_mosaic.version = 11 : i64} {
  func.func @_pos_embed_kernel(%arg0: i32, %arg1: memref<16xi32, #tpu.memory_space<smem>>, %arg2: memref<16x128xf32, #tpu.memory_space<vmem>>, %arg3: memref<64x128xf32, #tpu.memory_space<any>>, %arg4: memref<16x128xf32, #tpu.memory_space<vmem>>, %arg5: memref<16x128xf32, #tpu.memory_space<vmem>>, %arg6: memref<16x!tpu.dma_semaphore, #tpu.memory_space<semaphore_mem>>) attributes {dimension_semantics = [#tpu.dimension_semantics<parallel>], iteration_bounds = array<i64: 1>, scalar_prefetch = 1 : i64, scratch_operands = 2 : i64, tpu.core_type = #tpu.core_type<tc>, window_params = [{transform_indices = @transform_0, window_bounds = array<i64: 16, 128>}, {}, {transform_indices = @transform_2, window_bounds = array<i64: 16, 128>}]} {
    %c16_i32 = arith.constant 16 : i32
    %0 = arith.muli %arg0, %c16_i32 : i32
    %c0_i32 = arith.constant 0 : i32
    %1 = arith.addi %0, %c0_i32 : i32
    %2 = arith.index_cast %1 : i32 to index
    %3 = memref.load %arg1[%2] : memref<16xi32, #tpu.memory_space<smem>>
    %c0_i32_0 = arith.constant 0 : i32
    %c0_i32_1 = arith.constant 0 : i32
    %4 = tpu.memref_slice %arg3[%3, %c0_i32_1] : memref<64x128xf32, #tpu.memory_space<any>> -> memref<1x128xf32, #tpu.memory_space<any>>
    %c0_i32_2 = arith.constant 0 : i32
    %c0_i32_3 = arith.constant 0 : i32
    %5 = tpu.memref_slice %arg5[%c0_i32_2, %c0_i32_3] : memref<16x128xf32, #tpu.memory_space<vmem>> -> memref<1x128xf32, #tpu.memory_space<vmem>>
    %6 = tpu.memref_slice %arg6[%c0_i32_0] : memref<16x!tpu.dma_semaphore, #tpu.memory_space<semaphore_mem>> -> memref<1x!tpu.dma_semaphore, #tpu.memory_space<semaphore_mem>>
    %7 = tpu.memref_squeeze %6 : memref<1x!tpu.dma_semaphore, #tpu.memory_space<semaphore_mem>> -> memref<!tpu.dma_semaphore, #tpu.memory_space<semaphore_mem>>
    tpu.enqueue_dma source(%4 : memref<1x128xf32, #tpu.memory_space<any>>) target(%5 : memref<1x128xf32, #tpu.memory_space<vmem>>) target_semaphore(%7 : memref<!tpu.dma_semaphore, #tpu.memory_space<semaphore_mem>>)
    %c1_i32 = arith.constant 1 : i32
    %8 = arith.addi %0, %c1_i32 : i32
    %9 = arith.index_cast %8 : i32 to index
    %10 = memref.load %arg1[%9] : memref<16xi32, #tpu.memory_space<smem>>
    %c1_i32_4 = arith.constant 1 : i32
    %c0_i32_5 = arith.constant 0 : i32
    %11 = tpu.memref_slice %arg3[%10, %c0_i32_5] : memref<64x128xf32, #tpu.memory_space<any>> -> memref<1x128xf32, #tpu.memory_space<any>>
    %c1_i32_6 = arith.constant 1 : i32
    %c0_i32_7 = arith.constant 0 : i32
    %12 = tpu.memref_slice %arg5[%c1_i32_6, %c0_i32_7] : memref<16x128xf32, #tpu.memory_space<vmem>> -> memref<1x128xf32, #tpu.memory_space<vmem>>
    %13 = tpu.memref_slice %arg6[%c1_i32_4] : memref<16x!tpu.dma_semaphore, #tpu.memory_space<semaphore_mem>> -> memref<1x!tpu.dma_semaphore, #tpu.memory_space<semaphore_mem>>
    %14 = tpu.memref_squeeze %13 : memref<1x!tpu.dma_semaphore, #tpu.memory_space<semaphore_mem>> -> memref<!tpu.dma_semaphore, #tpu.memory_space<semaphore_mem>>
    tpu.enqueue_dma source(%11 : memref<1x128xf32, #tpu.memory_space<any>>) target(%12 : memref<1x128xf32, #tpu.memory_space<vmem>>) target_semaphore(%14 : memref<!tpu.dma_semaphore, #tpu.memory_space<semaphore_mem>>)
    %c2_i32 = arith.constant 2 : i32
    %15 = arith.addi %0, %c2_i32 : i32
    %16 = arith.index_cast %15 : i32 to index
    %17 = memref.load %arg1[%16] : memref<16xi32, #tpu.memory_space<smem>>
    %c2_i32_8 = arith.constant 2 : i32
    %c0_i32_9 = arith.constant 0 : i32
    %18 = tpu.memref_slice %arg3[%17, %c0_i32_9] : memref<64x128xf32, #tpu.memory_space<any>> -> memref<1x128xf32, #tpu.memory_space<any>>
    %c2_i32_10 = arith.constant 2 : i32
    %c0_i32_11 = arith.constant 0 : i32
    %19 = tpu.memref_slice %arg5[%c2_i32_10, %c0_i32_11] : memref<16x128xf32, #tpu.memory_space<vmem>> -> memref<1x128xf32, #tpu.memory_space<vmem>>
    %20 = tpu.memref_slice %arg6[%c2_i32_8] : memref<16x!tpu.dma_semaphore, #tpu.memory_space<semaphore_mem>> -> memref<1x!tpu.dma_semaphore, #tpu.memory_space<semaphore_mem>>
    %21 = tpu.memref_squeeze %20 : memref<1x!tpu.dma_semaphore, #tpu.memory_space<semaphore_mem>> -> memref<!tpu.dma_semaphore, #tpu.memory_space<semaphore_mem>>
    tpu.enqueue_dma source(%18 : memref<1x128xf32, #tpu.memory_space<any>>) target(%19 : memref<1x128xf32, #tpu.memory_space<vmem>>) target_semaphore(%21 : memref<!tpu.dma_semaphore, #tpu.memory_space<semaphore_mem>>)
    %c3_i32 = arith.constant 3 : i32
    %22 = arith.addi %0, %c3_i32 : i32
    %23 = arith.index_cast %22 : i32 to index
    %24 = memref.load %arg1[%23] : memref<16xi32, #tpu.memory_space<smem>>
    %c3_i32_12 = arith.constant 3 : i32
    %c0_i32_13 = arith.constant 0 : i32
    %25 = tpu.memref_slice %arg3[%24, %c0_i32_13] : memref<64x128xf32, #tpu.memory_space<any>> -> memref<1x128xf32, #tpu.memory_space<any>>
    %c3_i32_14 = arith.constant 3 : i32
    %c0_i32_15 = arith.constant 0 : i32
    %26 = tpu.memref_slice %arg5[%c3_i32_14, %c0_i32_15] : memref<16x128xf32, #tpu.memory_space<vmem>> -> memref<1x128xf32, #tpu.memory_space<vmem>>
    %27 = tpu.memref_slice %arg6[%c3_i32_12] : memref<16x!tpu.dma_semaphore, #tpu.memory_space<semaphore_mem>> -> memref<1x!tpu.dma_semaphore, #tpu.memory_space<semaphore_mem>>
    %28 = tpu.memref_squeeze %27 : memref<1x!tpu.dma_semaphore, #tpu.memory_space<semaphore_mem>> -> memref<!tpu.dma_semaphore, #tpu.memory_space<semaphore_mem>>
    tpu.enqueue_dma source(%25 : memref<1x128xf32, #tpu.memory_space<any>>) target(%26 : memref<1x128xf32, #tpu.memory_space<vmem>>) target_semaphore(%28 : memref<!tpu.dma_semaphore, #tpu.memory_space<semaphore_mem>>)
    %c4_i32 = arith.constant 4 : i32
    %29 = arith.addi %0, %c4_i32 : i32
    %30 = arith.index_cast %29 : i32 to index
    %31 = memref.load %arg1[%30] : memref<16xi32, #tpu.memory_space<smem>>
    %c4_i32_16 = arith.constant 4 : i32
    %c0_i32_17 = arith.constant 0 : i32
    %32 = tpu.memref_slice %arg3[%31, %c0_i32_17] : memref<64x128xf32, #tpu.memory_space<any>> -> memref<1x128xf32, #tpu.memory_space<any>>
    %c4_i32_18 = arith.constant 4 : i32
    %c0_i32_19 = arith.constant 0 : i32
    %33 = tpu.memref_slice %arg5[%c4_i32_18, %c0_i32_19] : memref<16x128xf32, #tpu.memory_space<vmem>> -> memref<1x128xf32, #tpu.memory_space<vmem>>
    %34 = tpu.memref_slice %arg6[%c4_i32_16] : memref<16x!tpu.dma_semaphore, #tpu.memory_space<semaphore_mem>> -> memref<1x!tpu.dma_semaphore, #tpu.memory_space<semaphore_mem>>
    %35 = tpu.memref_squeeze %34 : memref<1x!tpu.dma_semaphore, #tpu.memory_space<semaphore_mem>> -> memref<!tpu.dma_semaphore, #tpu.memory_space<semaphore_mem>>
    tpu.enqueue_dma source(%32 : memref<1x128xf32, #tpu.memory_space<any>>) target(%33 : memref<1x128xf32, #tpu.memory_space<vmem>>) target_semaphore(%35 : memref<!tpu.dma_semaphore, #tpu.memory_space<semaphore_mem>>)
    %c5_i32 = arith.constant 5 : i32
    %36 = arith.addi %0, %c5_i32 : i32
    %37 = arith.index_cast %36 : i32 to index
    %38 = memref.load %arg1[%37] : memref<16xi32, #tpu.memory_space<smem>>
    %c5_i32_20 = arith.constant 5 : i32
    %c0_i32_21 = arith.constant 0 : i32
    %39 = tpu.memref_slice %arg3[%38, %c0_i32_21] : memref<64x128xf32, #tpu.memory_space<any>> -> memref<1x128xf32, #tpu.memory_space<any>>
    %c5_i32_22 = arith.constant 5 : i32
    %c0_i32_23 = arith.constant 0 : i32
    %40 = tpu.memref_slice %arg5[%c5_i32_22, %c0_i32_23] : memref<16x128xf32, #tpu.memory_space<vmem>> -> memref<1x128xf32, #tpu.memory_space<vmem>>
    %41 = tpu.memref_slice %arg6[%c5_i32_20] : memref<16x!tpu.dma_semaphore, #tpu.memory_space<semaphore_mem>> -> memref<1x!tpu.dma_semaphore, #tpu.memory_space<semaphore_mem>>
    %42 = tpu.memref_squeeze %41 : memref<1x!tpu.dma_semaphore, #tpu.memory_space<semaphore_mem>> -> memref<!tpu.dma_semaphore, #tpu.memory_space<semaphore_mem>>
    tpu.enqueue_dma source(%39 : memref<1x128xf32, #tpu.memory_space<any>>) target(%40 : memref<1x128xf32, #tpu.memory_space<vmem>>) target_semaphore(%42 : memref<!tpu.dma_semaphore, #tpu.memory_space<semaphore_mem>>)
    %c6_i32 = arith.constant 6 : i32
    %43 = arith.addi %0, %c6_i32 : i32
    %44 = arith.index_cast %43 : i32 to index
    %45 = memref.load %arg1[%44] : memref<16xi32, #tpu.memory_space<smem>>
    %c6_i32_24 = arith.constant 6 : i32
    %c0_i32_25 = arith.constant 0 : i32
    %46 = tpu.memref_slice %arg3[%45, %c0_i32_25] : memref<64x128xf32, #tpu.memory_space<any>> -> memref<1x128xf32, #tpu.memory_space<any>>
    %c6_i32_26 = arith.constant 6 : i32
    %c0_i32_27 = arith.constant 0 : i32
    %47 = tpu.memref_slice %arg5[%c6_i32_26, %c0_i32_27] : memref<16x128xf32, #tpu.memory_space<vmem>> -> memref<1x128xf32, #tpu.memory_space<vmem>>
    %48 = tpu.memref_slice %arg6[%c6_i32_24] : memref<16x!tpu.dma_semaphore, #tpu.memory_space<semaphore_mem>> -> memref<1x!tpu.dma_semaphore, #tpu.memory_space<semaphore_mem>>
    %49 = tpu.memref_squeeze %48 : memref<1x!tpu.dma_semaphore, #tpu.memory_space<semaphore_mem>> -> memref<!tpu.dma_semaphore, #tpu.memory_space<semaphore_mem>>
    tpu.enqueue_dma source(%46 : memref<1x128xf32, #tpu.memory_space<any>>) target(%47 : memref<1x128xf32, #tpu.memory_space<vmem>>) target_semaphore(%49 : memref<!tpu.dma_semaphore, #tpu.memory_space<semaphore_mem>>)
    %c7_i32 = arith.constant 7 : i32
    %50 = arith.addi %0, %c7_i32 : i32
    %51 = arith.index_cast %50 : i32 to index
    %52 = memref.load %arg1[%51] : memref<16xi32, #tpu.memory_space<smem>>
    %c7_i32_28 = arith.constant 7 : i32
    %c0_i32_29 = arith.constant 0 : i32
    %53 = tpu.memref_slice %arg3[%52, %c0_i32_29] : memref<64x128xf32, #tpu.memory_space<any>> -> memref<1x128xf32, #tpu.memory_space<any>>
    %c7_i32_30 = arith.constant 7 : i32
    %c0_i32_31 = arith.constant 0 : i32
    %54 = tpu.memref_slice %arg5[%c7_i32_30, %c0_i32_31] : memref<16x128xf32, #tpu.memory_space<vmem>> -> memref<1x128xf32, #tpu.memory_space<vmem>>
    %55 = tpu.memref_slice %arg6[%c7_i32_28] : memref<16x!tpu.dma_semaphore, #tpu.memory_space<semaphore_mem>> -> memref<1x!tpu.dma_semaphore, #tpu.memory_space<semaphore_mem>>
    %56 = tpu.memref_squeeze %55 : memref<1x!tpu.dma_semaphore, #tpu.memory_space<semaphore_mem>> -> memref<!tpu.dma_semaphore, #tpu.memory_space<semaphore_mem>>
    tpu.enqueue_dma source(%53 : memref<1x128xf32, #tpu.memory_space<any>>) target(%54 : memref<1x128xf32, #tpu.memory_space<vmem>>) target_semaphore(%56 : memref<!tpu.dma_semaphore, #tpu.memory_space<semaphore_mem>>)
    %c8_i32 = arith.constant 8 : i32
    %57 = arith.addi %0, %c8_i32 : i32
    %58 = arith.index_cast %57 : i32 to index
    %59 = memref.load %arg1[%58] : memref<16xi32, #tpu.memory_space<smem>>
    %c8_i32_32 = arith.constant 8 : i32
    %c0_i32_33 = arith.constant 0 : i32
    %60 = tpu.memref_slice %arg3[%59, %c0_i32_33] : memref<64x128xf32, #tpu.memory_space<any>> -> memref<1x128xf32, #tpu.memory_space<any>>
    %c8_i32_34 = arith.constant 8 : i32
    %c0_i32_35 = arith.constant 0 : i32
    %61 = tpu.memref_slice %arg5[%c8_i32_34, %c0_i32_35] : memref<16x128xf32, #tpu.memory_space<vmem>> -> memref<1x128xf32, #tpu.memory_space<vmem>>
    %62 = tpu.memref_slice %arg6[%c8_i32_32] : memref<16x!tpu.dma_semaphore, #tpu.memory_space<semaphore_mem>> -> memref<1x!tpu.dma_semaphore, #tpu.memory_space<semaphore_mem>>
    %63 = tpu.memref_squeeze %62 : memref<1x!tpu.dma_semaphore, #tpu.memory_space<semaphore_mem>> -> memref<!tpu.dma_semaphore, #tpu.memory_space<semaphore_mem>>
    tpu.enqueue_dma source(%60 : memref<1x128xf32, #tpu.memory_space<any>>) target(%61 : memref<1x128xf32, #tpu.memory_space<vmem>>) target_semaphore(%63 : memref<!tpu.dma_semaphore, #tpu.memory_space<semaphore_mem>>)
    %c9_i32 = arith.constant 9 : i32
    %64 = arith.addi %0, %c9_i32 : i32
    %65 = arith.index_cast %64 : i32 to index
    %66 = memref.load %arg1[%65] : memref<16xi32, #tpu.memory_space<smem>>
    %c9_i32_36 = arith.constant 9 : i32
    %c0_i32_37 = arith.constant 0 : i32
    %67 = tpu.memref_slice %arg3[%66, %c0_i32_37] : memref<64x128xf32, #tpu.memory_space<any>> -> memref<1x128xf32, #tpu.memory_space<any>>
    %c9_i32_38 = arith.constant 9 : i32
    %c0_i32_39 = arith.constant 0 : i32
    %68 = tpu.memref_slice %arg5[%c9_i32_38, %c0_i32_39] : memref<16x128xf32, #tpu.memory_space<vmem>> -> memref<1x128xf32, #tpu.memory_space<vmem>>
    %69 = tpu.memref_slice %arg6[%c9_i32_36] : memref<16x!tpu.dma_semaphore, #tpu.memory_space<semaphore_mem>> -> memref<1x!tpu.dma_semaphore, #tpu.memory_space<semaphore_mem>>
    %70 = tpu.memref_squeeze %69 : memref<1x!tpu.dma_semaphore, #tpu.memory_space<semaphore_mem>> -> memref<!tpu.dma_semaphore, #tpu.memory_space<semaphore_mem>>
    tpu.enqueue_dma source(%67 : memref<1x128xf32, #tpu.memory_space<any>>) target(%68 : memref<1x128xf32, #tpu.memory_space<vmem>>) target_semaphore(%70 : memref<!tpu.dma_semaphore, #tpu.memory_space<semaphore_mem>>)
    %c10_i32 = arith.constant 10 : i32
    %71 = arith.addi %0, %c10_i32 : i32
    %72 = arith.index_cast %71 : i32 to index
    %73 = memref.load %arg1[%72] : memref<16xi32, #tpu.memory_space<smem>>
    %c10_i32_40 = arith.constant 10 : i32
    %c0_i32_41 = arith.constant 0 : i32
    %74 = tpu.memref_slice %arg3[%73, %c0_i32_41] : memref<64x128xf32, #tpu.memory_space<any>> -> memref<1x128xf32, #tpu.memory_space<any>>
    %c10_i32_42 = arith.constant 10 : i32
    %c0_i32_43 = arith.constant 0 : i32
    %75 = tpu.memref_slice %arg5[%c10_i32_42, %c0_i32_43] : memref<16x128xf32, #tpu.memory_space<vmem>> -> memref<1x128xf32, #tpu.memory_space<vmem>>
    %76 = tpu.memref_slice %arg6[%c10_i32_40] : memref<16x!tpu.dma_semaphore, #tpu.memory_space<semaphore_mem>> -> memref<1x!tpu.dma_semaphore, #tpu.memory_space<semaphore_mem>>
    %77 = tpu.memref_squeeze %76 : memref<1x!tpu.dma_semaphore, #tpu.memory_space<semaphore_mem>> -> memref<!tpu.dma_semaphore, #tpu.memory_space<semaphore_mem>>
    tpu.enqueue_dma source(%74 : memref<1x128xf32, #tpu.memory_space<any>>) target(%75 : memref<1x128xf32, #tpu.memory_space<vmem>>) target_semaphore(%77 : memref<!tpu.dma_semaphore, #tpu.memory_space<semaphore_mem>>)
    %c11_i32 = arith.constant 11 : i32
    %78 = arith.addi %0, %c11_i32 : i32
    %79 = arith.index_cast %78 : i32 to index
    %80 = memref.load %arg1[%79] : memref<16xi32, #tpu.memory_space<smem>>
    %c11_i32_44 = arith.constant 11 : i32
    %c0_i32_45 = arith.constant 0 : i32
    %81 = tpu.memref_slice %arg3[%80, %c0_i32_45] : memref<64x128xf32, #tpu.memory_space<any>> -> memref<1x128xf32, #tpu.memory_space<any>>
    %c11_i32_46 = arith.constant 11 : i32
    %c0_i32_47 = arith.constant 0 : i32
    %82 = tpu.memref_slice %arg5[%c11_i32_46, %c0_i32_47] : memref<16x128xf32, #tpu.memory_space<vmem>> -> memref<1x128xf32, #tpu.memory_space<vmem>>
    %83 = tpu.memref_slice %arg6[%c11_i32_44] : memref<16x!tpu.dma_semaphore, #tpu.memory_space<semaphore_mem>> -> memref<1x!tpu.dma_semaphore, #tpu.memory_space<semaphore_mem>>
    %84 = tpu.memref_squeeze %83 : memref<1x!tpu.dma_semaphore, #tpu.memory_space<semaphore_mem>> -> memref<!tpu.dma_semaphore, #tpu.memory_space<semaphore_mem>>
    tpu.enqueue_dma source(%81 : memref<1x128xf32, #tpu.memory_space<any>>) target(%82 : memref<1x128xf32, #tpu.memory_space<vmem>>) target_semaphore(%84 : memref<!tpu.dma_semaphore, #tpu.memory_space<semaphore_mem>>)
    %c12_i32 = arith.constant 12 : i32
    %85 = arith.addi %0, %c12_i32 : i32
    %86 = arith.index_cast %85 : i32 to index
    %87 = memref.load %arg1[%86] : memref<16xi32, #tpu.memory_space<smem>>
    %c12_i32_48 = arith.constant 12 : i32
    %c0_i32_49 = arith.constant 0 : i32
    %88 = tpu.memref_slice %arg3[%87, %c0_i32_49] : memref<64x128xf32, #tpu.memory_space<any>> -> memref<1x128xf32, #tpu.memory_space<any>>
    %c12_i32_50 = arith.constant 12 : i32
    %c0_i32_51 = arith.constant 0 : i32
    %89 = tpu.memref_slice %arg5[%c12_i32_50, %c0_i32_51] : memref<16x128xf32, #tpu.memory_space<vmem>> -> memref<1x128xf32, #tpu.memory_space<vmem>>
    %90 = tpu.memref_slice %arg6[%c12_i32_48] : memref<16x!tpu.dma_semaphore, #tpu.memory_space<semaphore_mem>> -> memref<1x!tpu.dma_semaphore, #tpu.memory_space<semaphore_mem>>
    %91 = tpu.memref_squeeze %90 : memref<1x!tpu.dma_semaphore, #tpu.memory_space<semaphore_mem>> -> memref<!tpu.dma_semaphore, #tpu.memory_space<semaphore_mem>>
    tpu.enqueue_dma source(%88 : memref<1x128xf32, #tpu.memory_space<any>>) target(%89 : memref<1x128xf32, #tpu.memory_space<vmem>>) target_semaphore(%91 : memref<!tpu.dma_semaphore, #tpu.memory_space<semaphore_mem>>)
    %c13_i32 = arith.constant 13 : i32
    %92 = arith.addi %0, %c13_i32 : i32
    %93 = arith.index_cast %92 : i32 to index
    %94 = memref.load %arg1[%93] : memref<16xi32, #tpu.memory_space<smem>>
    %c13_i32_52 = arith.constant 13 : i32
    %c0_i32_53 = arith.constant 0 : i32
    %95 = tpu.memref_slice %arg3[%94, %c0_i32_53] : memref<64x128xf32, #tpu.memory_space<any>> -> memref<1x128xf32, #tpu.memory_space<any>>
    %c13_i32_54 = arith.constant 13 : i32
    %c0_i32_55 = arith.constant 0 : i32
    %96 = tpu.memref_slice %arg5[%c13_i32_54, %c0_i32_55] : memref<16x128xf32, #tpu.memory_space<vmem>> -> memref<1x128xf32, #tpu.memory_space<vmem>>
    %97 = tpu.memref_slice %arg6[%c13_i32_52] : memref<16x!tpu.dma_semaphore, #tpu.memory_space<semaphore_mem>> -> memref<1x!tpu.dma_semaphore, #tpu.memory_space<semaphore_mem>>
    %98 = tpu.memref_squeeze %97 : memref<1x!tpu.dma_semaphore, #tpu.memory_space<semaphore_mem>> -> memref<!tpu.dma_semaphore, #tpu.memory_space<semaphore_mem>>
    tpu.enqueue_dma source(%95 : memref<1x128xf32, #tpu.memory_space<any>>) target(%96 : memref<1x128xf32, #tpu.memory_space<vmem>>) target_semaphore(%98 : memref<!tpu.dma_semaphore, #tpu.memory_space<semaphore_mem>>)
    %c14_i32 = arith.constant 14 : i32
    %99 = arith.addi %0, %c14_i32 : i32
    %100 = arith.index_cast %99 : i32 to index
    %101 = memref.load %arg1[%100] : memref<16xi32, #tpu.memory_space<smem>>
    %c14_i32_56 = arith.constant 14 : i32
    %c0_i32_57 = arith.constant 0 : i32
    %102 = tpu.memref_slice %arg3[%101, %c0_i32_57] : memref<64x128xf32, #tpu.memory_space<any>> -> memref<1x128xf32, #tpu.memory_space<any>>
    %c14_i32_58 = arith.constant 14 : i32
    %c0_i32_59 = arith.constant 0 : i32
    %103 = tpu.memref_slice %arg5[%c14_i32_58, %c0_i32_59] : memref<16x128xf32, #tpu.memory_space<vmem>> -> memref<1x128xf32, #tpu.memory_space<vmem>>
    %104 = tpu.memref_slice %arg6[%c14_i32_56] : memref<16x!tpu.dma_semaphore, #tpu.memory_space<semaphore_mem>> -> memref<1x!tpu.dma_semaphore, #tpu.memory_space<semaphore_mem>>
    %105 = tpu.memref_squeeze %104 : memref<1x!tpu.dma_semaphore, #tpu.memory_space<semaphore_mem>> -> memref<!tpu.dma_semaphore, #tpu.memory_space<semaphore_mem>>
    tpu.enqueue_dma source(%102 : memref<1x128xf32, #tpu.memory_space<any>>) target(%103 : memref<1x128xf32, #tpu.memory_space<vmem>>) target_semaphore(%105 : memref<!tpu.dma_semaphore, #tpu.memory_space<semaphore_mem>>)
    %c15_i32 = arith.constant 15 : i32
    %106 = arith.addi %0, %c15_i32 : i32
    %107 = arith.index_cast %106 : i32 to index
    %108 = memref.load %arg1[%107] : memref<16xi32, #tpu.memory_space<smem>>
    %c15_i32_60 = arith.constant 15 : i32
    %c0_i32_61 = arith.constant 0 : i32
    %109 = tpu.memref_slice %arg3[%108, %c0_i32_61] : memref<64x128xf32, #tpu.memory_space<any>> -> memref<1x128xf32, #tpu.memory_space<any>>
    %c15_i32_62 = arith.constant 15 : i32
    %c0_i32_63 = arith.constant 0 : i32
    %110 = tpu.memref_slice %arg5[%c15_i32_62, %c0_i32_63] : memref<16x128xf32, #tpu.memory_space<vmem>> -> memref<1x128xf32, #tpu.memory_space<vmem>>
    %111 = tpu.memref_slice %arg6[%c15_i32_60] : memref<16x!tpu.dma_semaphore, #tpu.memory_space<semaphore_mem>> -> memref<1x!tpu.dma_semaphore, #tpu.memory_space<semaphore_mem>>
    %112 = tpu.memref_squeeze %111 : memref<1x!tpu.dma_semaphore, #tpu.memory_space<semaphore_mem>> -> memref<!tpu.dma_semaphore, #tpu.memory_space<semaphore_mem>>
    tpu.enqueue_dma source(%109 : memref<1x128xf32, #tpu.memory_space<any>>) target(%110 : memref<1x128xf32, #tpu.memory_space<vmem>>) target_semaphore(%112 : memref<!tpu.dma_semaphore, #tpu.memory_space<semaphore_mem>>)
    %c0_i32_64 = arith.constant 0 : i32
    %c0_i32_65 = arith.constant 0 : i32
    %c0_i32_66 = arith.constant 0 : i32
    %113 = tpu.memref_slice %arg3[%c0_i32_65, %c0_i32_66] : memref<64x128xf32, #tpu.memory_space<any>> -> memref<1x128xf32, #tpu.memory_space<any>>
    %c0_i32_67 = arith.constant 0 : i32
    %c0_i32_68 = arith.constant 0 : i32
    %114 = tpu.memref_slice %arg5[%c0_i32_67, %c0_i32_68] : memref<16x128xf32, #tpu.memory_space<vmem>> -> memref<1x128xf32, #tpu.memory_space<vmem>>
    %115 = tpu.memref_slice %arg6[%c0_i32_64] : memref<16x!tpu.dma_semaphore, #tpu.memory_space<semaphore_mem>> -> memref<1x!tpu.dma_semaphore, #tpu.memory_space<semaphore_mem>>
    %116 = tpu.memref_squeeze %115 : memref<1x!tpu.dma_semaphore, #tpu.memory_space<semaphore_mem>> -> memref<!tpu.dma_semaphore, #tpu.memory_space<semaphore_mem>>
    tpu.wait_dma2 semaphore(%116 : memref<!tpu.dma_semaphore, #tpu.memory_space<semaphore_mem>>) src(%113 : memref<1x128xf32, #tpu.memory_space<any>>) dst(%114 : memref<1x128xf32, #tpu.memory_space<vmem>>)
    %c1_i32_69 = arith.constant 1 : i32
    %c0_i32_70 = arith.constant 0 : i32
    %c0_i32_71 = arith.constant 0 : i32
    %117 = tpu.memref_slice %arg3[%c0_i32_70, %c0_i32_71] : memref<64x128xf32, #tpu.memory_space<any>> -> memref<1x128xf32, #tpu.memory_space<any>>
    %c1_i32_72 = arith.constant 1 : i32
    %c0_i32_73 = arith.constant 0 : i32
    %118 = tpu.memref_slice %arg5[%c1_i32_72, %c0_i32_73] : memref<16x128xf32, #tpu.memory_space<vmem>> -> memref<1x128xf32, #tpu.memory_space<vmem>>
    %119 = tpu.memref_slice %arg6[%c1_i32_69] : memref<16x!tpu.dma_semaphore, #tpu.memory_space<semaphore_mem>> -> memref<1x!tpu.dma_semaphore, #tpu.memory_space<semaphore_mem>>
    %120 = tpu.memref_squeeze %119 : memref<1x!tpu.dma_semaphore, #tpu.memory_space<semaphore_mem>> -> memref<!tpu.dma_semaphore, #tpu.memory_space<semaphore_mem>>
    tpu.wait_dma2 semaphore(%120 : memref<!tpu.dma_semaphore, #tpu.memory_space<semaphore_mem>>) src(%117 : memref<1x128xf32, #tpu.memory_space<any>>) dst(%118 : memref<1x128xf32, #tpu.memory_space<vmem>>)
    %c2_i32_74 = arith.constant 2 : i32
    %c0_i32_75 = arith.constant 0 : i32
    %c0_i32_76 = arith.constant 0 : i32
    %121 = tpu.memref_slice %arg3[%c0_i32_75, %c0_i32_76] : memref<64x128xf32, #tpu.memory_space<any>> -> memref<1x128xf32, #tpu.memory_space<any>>
    %c2_i32_77 = arith.constant 2 : i32
    %c0_i32_78 = arith.constant 0 : i32
    %122 = tpu.memref_slice %arg5[%c2_i32_77, %c0_i32_78] : memref<16x128xf32, #tpu.memory_space<vmem>> -> memref<1x128xf32, #tpu.memory_space<vmem>>
    %123 = tpu.memref_slice %arg6[%c2_i32_74] : memref<16x!tpu.dma_semaphore, #tpu.memory_space<semaphore_mem>> -> memref<1x!tpu.dma_semaphore, #tpu.memory_space<semaphore_mem>>
    %124 = tpu.memref_squeeze %123 : memref<1x!tpu.dma_semaphore, #tpu.memory_space<semaphore_mem>> -> memref<!tpu.dma_semaphore, #tpu.memory_space<semaphore_mem>>
    tpu.wait_dma2 semaphore(%124 : memref<!tpu.dma_semaphore, #tpu.memory_space<semaphore_mem>>) src(%121 : memref<1x128xf32, #tpu.memory_space<any>>) dst(%122 : memref<1x128xf32, #tpu.memory_space<vmem>>)
    %c3_i32_79 = arith.constant 3 : i32
    %c0_i32_80 = arith.constant 0 : i32
    %c0_i32_81 = arith.constant 0 : i32
    %125 = tpu.memref_slice %arg3[%c0_i32_80, %c0_i32_81] : memref<64x128xf32, #tpu.memory_space<any>> -> memref<1x128xf32, #tpu.memory_space<any>>
    %c3_i32_82 = arith.constant 3 : i32
    %c0_i32_83 = arith.constant 0 : i32
    %126 = tpu.memref_slice %arg5[%c3_i32_82, %c0_i32_83] : memref<16x128xf32, #tpu.memory_space<vmem>> -> memref<1x128xf32, #tpu.memory_space<vmem>>
    %127 = tpu.memref_slice %arg6[%c3_i32_79] : memref<16x!tpu.dma_semaphore, #tpu.memory_space<semaphore_mem>> -> memref<1x!tpu.dma_semaphore, #tpu.memory_space<semaphore_mem>>
    %128 = tpu.memref_squeeze %127 : memref<1x!tpu.dma_semaphore, #tpu.memory_space<semaphore_mem>> -> memref<!tpu.dma_semaphore, #tpu.memory_space<semaphore_mem>>
    tpu.wait_dma2 semaphore(%128 : memref<!tpu.dma_semaphore, #tpu.memory_space<semaphore_mem>>) src(%125 : memref<1x128xf32, #tpu.memory_space<any>>) dst(%126 : memref<1x128xf32, #tpu.memory_space<vmem>>)
    %c4_i32_84 = arith.constant 4 : i32
    %c0_i32_85 = arith.constant 0 : i32
    %c0_i32_86 = arith.constant 0 : i32
    %129 = tpu.memref_slice %arg3[%c0_i32_85, %c0_i32_86] : memref<64x128xf32, #tpu.memory_space<any>> -> memref<1x128xf32, #tpu.memory_space<any>>
    %c4_i32_87 = arith.constant 4 : i32
    %c0_i32_88 = arith.constant 0 : i32
    %130 = tpu.memref_slice %arg5[%c4_i32_87, %c0_i32_88] : memref<16x128xf32, #tpu.memory_space<vmem>> -> memref<1x128xf32, #tpu.memory_space<vmem>>
    %131 = tpu.memref_slice %arg6[%c4_i32_84] : memref<16x!tpu.dma_semaphore, #tpu.memory_space<semaphore_mem>> -> memref<1x!tpu.dma_semaphore, #tpu.memory_space<semaphore_mem>>
    %132 = tpu.memref_squeeze %131 : memref<1x!tpu.dma_semaphore, #tpu.memory_space<semaphore_mem>> -> memref<!tpu.dma_semaphore, #tpu.memory_space<semaphore_mem>>
    tpu.wait_dma2 semaphore(%132 : memref<!tpu.dma_semaphore, #tpu.memory_space<semaphore_mem>>) src(%129 : memref<1x128xf32, #tpu.memory_space<any>>) dst(%130 : memref<1x128xf32, #tpu.memory_space<vmem>>)
    %c5_i32_89 = arith.constant 5 : i32
    %c0_i32_90 = arith.constant 0 : i32
    %c0_i32_91 = arith.constant 0 : i32
    %133 = tpu.memref_slice %arg3[%c0_i32_90, %c0_i32_91] : memref<64x128xf32, #tpu.memory_space<any>> -> memref<1x128xf32, #tpu.memory_space<any>>
    %c5_i32_92 = arith.constant 5 : i32
    %c0_i32_93 = arith.constant 0 : i32
    %134 = tpu.memref_slice %arg5[%c5_i32_92, %c0_i32_93] : memref<16x128xf32, #tpu.memory_space<vmem>> -> memref<1x128xf32, #tpu.memory_space<vmem>>
    %135 = tpu.memref_slice %arg6[%c5_i32_89] : memref<16x!tpu.dma_semaphore, #tpu.memory_space<semaphore_mem>> -> memref<1x!tpu.dma_semaphore, #tpu.memory_space<semaphore_mem>>
    %136 = tpu.memref_squeeze %135 : memref<1x!tpu.dma_semaphore, #tpu.memory_space<semaphore_mem>> -> memref<!tpu.dma_semaphore, #tpu.memory_space<semaphore_mem>>
    tpu.wait_dma2 semaphore(%136 : memref<!tpu.dma_semaphore, #tpu.memory_space<semaphore_mem>>) src(%133 : memref<1x128xf32, #tpu.memory_space<any>>) dst(%134 : memref<1x128xf32, #tpu.memory_space<vmem>>)
    %c6_i32_94 = arith.constant 6 : i32
    %c0_i32_95 = arith.constant 0 : i32
    %c0_i32_96 = arith.constant 0 : i32
    %137 = tpu.memref_slice %arg3[%c0_i32_95, %c0_i32_96] : memref<64x128xf32, #tpu.memory_space<any>> -> memref<1x128xf32, #tpu.memory_space<any>>
    %c6_i32_97 = arith.constant 6 : i32
    %c0_i32_98 = arith.constant 0 : i32
    %138 = tpu.memref_slice %arg5[%c6_i32_97, %c0_i32_98] : memref<16x128xf32, #tpu.memory_space<vmem>> -> memref<1x128xf32, #tpu.memory_space<vmem>>
    %139 = tpu.memref_slice %arg6[%c6_i32_94] : memref<16x!tpu.dma_semaphore, #tpu.memory_space<semaphore_mem>> -> memref<1x!tpu.dma_semaphore, #tpu.memory_space<semaphore_mem>>
    %140 = tpu.memref_squeeze %139 : memref<1x!tpu.dma_semaphore, #tpu.memory_space<semaphore_mem>> -> memref<!tpu.dma_semaphore, #tpu.memory_space<semaphore_mem>>
    tpu.wait_dma2 semaphore(%140 : memref<!tpu.dma_semaphore, #tpu.memory_space<semaphore_mem>>) src(%137 : memref<1x128xf32, #tpu.memory_space<any>>) dst(%138 : memref<1x128xf32, #tpu.memory_space<vmem>>)
    %c7_i32_99 = arith.constant 7 : i32
    %c0_i32_100 = arith.constant 0 : i32
    %c0_i32_101 = arith.constant 0 : i32
    %141 = tpu.memref_slice %arg3[%c0_i32_100, %c0_i32_101] : memref<64x128xf32, #tpu.memory_space<any>> -> memref<1x128xf32, #tpu.memory_space<any>>
    %c7_i32_102 = arith.constant 7 : i32
    %c0_i32_103 = arith.constant 0 : i32
    %142 = tpu.memref_slice %arg5[%c7_i32_102, %c0_i32_103] : memref<16x128xf32, #tpu.memory_space<vmem>> -> memref<1x128xf32, #tpu.memory_space<vmem>>
    %143 = tpu.memref_slice %arg6[%c7_i32_99] : memref<16x!tpu.dma_semaphore, #tpu.memory_space<semaphore_mem>> -> memref<1x!tpu.dma_semaphore, #tpu.memory_space<semaphore_mem>>
    %144 = tpu.memref_squeeze %143 : memref<1x!tpu.dma_semaphore, #tpu.memory_space<semaphore_mem>> -> memref<!tpu.dma_semaphore, #tpu.memory_space<semaphore_mem>>
    tpu.wait_dma2 semaphore(%144 : memref<!tpu.dma_semaphore, #tpu.memory_space<semaphore_mem>>) src(%141 : memref<1x128xf32, #tpu.memory_space<any>>) dst(%142 : memref<1x128xf32, #tpu.memory_space<vmem>>)
    %c8_i32_104 = arith.constant 8 : i32
    %c0_i32_105 = arith.constant 0 : i32
    %c0_i32_106 = arith.constant 0 : i32
    %145 = tpu.memref_slice %arg3[%c0_i32_105, %c0_i32_106] : memref<64x128xf32, #tpu.memory_space<any>> -> memref<1x128xf32, #tpu.memory_space<any>>
    %c8_i32_107 = arith.constant 8 : i32
    %c0_i32_108 = arith.constant 0 : i32
    %146 = tpu.memref_slice %arg5[%c8_i32_107, %c0_i32_108] : memref<16x128xf32, #tpu.memory_space<vmem>> -> memref<1x128xf32, #tpu.memory_space<vmem>>
    %147 = tpu.memref_slice %arg6[%c8_i32_104] : memref<16x!tpu.dma_semaphore, #tpu.memory_space<semaphore_mem>> -> memref<1x!tpu.dma_semaphore, #tpu.memory_space<semaphore_mem>>
    %148 = tpu.memref_squeeze %147 : memref<1x!tpu.dma_semaphore, #tpu.memory_space<semaphore_mem>> -> memref<!tpu.dma_semaphore, #tpu.memory_space<semaphore_mem>>
    tpu.wait_dma2 semaphore(%148 : memref<!tpu.dma_semaphore, #tpu.memory_space<semaphore_mem>>) src(%145 : memref<1x128xf32, #tpu.memory_space<any>>) dst(%146 : memref<1x128xf32, #tpu.memory_space<vmem>>)
    %c9_i32_109 = arith.constant 9 : i32
    %c0_i32_110 = arith.constant 0 : i32
    %c0_i32_111 = arith.constant 0 : i32
    %149 = tpu.memref_slice %arg3[%c0_i32_110, %c0_i32_111] : memref<64x128xf32, #tpu.memory_space<any>> -> memref<1x128xf32, #tpu.memory_space<any>>
    %c9_i32_112 = arith.constant 9 : i32
    %c0_i32_113 = arith.constant 0 : i32
    %150 = tpu.memref_slice %arg5[%c9_i32_112, %c0_i32_113] : memref<16x128xf32, #tpu.memory_space<vmem>> -> memref<1x128xf32, #tpu.memory_space<vmem>>
    %151 = tpu.memref_slice %arg6[%c9_i32_109] : memref<16x!tpu.dma_semaphore, #tpu.memory_space<semaphore_mem>> -> memref<1x!tpu.dma_semaphore, #tpu.memory_space<semaphore_mem>>
    %152 = tpu.memref_squeeze %151 : memref<1x!tpu.dma_semaphore, #tpu.memory_space<semaphore_mem>> -> memref<!tpu.dma_semaphore, #tpu.memory_space<semaphore_mem>>
    tpu.wait_dma2 semaphore(%152 : memref<!tpu.dma_semaphore, #tpu.memory_space<semaphore_mem>>) src(%149 : memref<1x128xf32, #tpu.memory_space<any>>) dst(%150 : memref<1x128xf32, #tpu.memory_space<vmem>>)
    %c10_i32_114 = arith.constant 10 : i32
    %c0_i32_115 = arith.constant 0 : i32
    %c0_i32_116 = arith.constant 0 : i32
    %153 = tpu.memref_slice %arg3[%c0_i32_115, %c0_i32_116] : memref<64x128xf32, #tpu.memory_space<any>> -> memref<1x128xf32, #tpu.memory_space<any>>
    %c10_i32_117 = arith.constant 10 : i32
    %c0_i32_118 = arith.constant 0 : i32
    %154 = tpu.memref_slice %arg5[%c10_i32_117, %c0_i32_118] : memref<16x128xf32, #tpu.memory_space<vmem>> -> memref<1x128xf32, #tpu.memory_space<vmem>>
    %155 = tpu.memref_slice %arg6[%c10_i32_114] : memref<16x!tpu.dma_semaphore, #tpu.memory_space<semaphore_mem>> -> memref<1x!tpu.dma_semaphore, #tpu.memory_space<semaphore_mem>>
    %156 = tpu.memref_squeeze %155 : memref<1x!tpu.dma_semaphore, #tpu.memory_space<semaphore_mem>> -> memref<!tpu.dma_semaphore, #tpu.memory_space<semaphore_mem>>
    tpu.wait_dma2 semaphore(%156 : memref<!tpu.dma_semaphore, #tpu.memory_space<semaphore_mem>>) src(%153 : memref<1x128xf32, #tpu.memory_space<any>>) dst(%154 : memref<1x128xf32, #tpu.memory_space<vmem>>)
    %c11_i32_119 = arith.constant 11 : i32
    %c0_i32_120 = arith.constant 0 : i32
    %c0_i32_121 = arith.constant 0 : i32
    %157 = tpu.memref_slice %arg3[%c0_i32_120, %c0_i32_121] : memref<64x128xf32, #tpu.memory_space<any>> -> memref<1x128xf32, #tpu.memory_space<any>>
    %c11_i32_122 = arith.constant 11 : i32
    %c0_i32_123 = arith.constant 0 : i32
    %158 = tpu.memref_slice %arg5[%c11_i32_122, %c0_i32_123] : memref<16x128xf32, #tpu.memory_space<vmem>> -> memref<1x128xf32, #tpu.memory_space<vmem>>
    %159 = tpu.memref_slice %arg6[%c11_i32_119] : memref<16x!tpu.dma_semaphore, #tpu.memory_space<semaphore_mem>> -> memref<1x!tpu.dma_semaphore, #tpu.memory_space<semaphore_mem>>
    %160 = tpu.memref_squeeze %159 : memref<1x!tpu.dma_semaphore, #tpu.memory_space<semaphore_mem>> -> memref<!tpu.dma_semaphore, #tpu.memory_space<semaphore_mem>>
    tpu.wait_dma2 semaphore(%160 : memref<!tpu.dma_semaphore, #tpu.memory_space<semaphore_mem>>) src(%157 : memref<1x128xf32, #tpu.memory_space<any>>) dst(%158 : memref<1x128xf32, #tpu.memory_space<vmem>>)
    %c12_i32_124 = arith.constant 12 : i32
    %c0_i32_125 = arith.constant 0 : i32
    %c0_i32_126 = arith.constant 0 : i32
    %161 = tpu.memref_slice %arg3[%c0_i32_125, %c0_i32_126] : memref<64x128xf32, #tpu.memory_space<any>> -> memref<1x128xf32, #tpu.memory_space<any>>
    %c12_i32_127 = arith.constant 12 : i32
    %c0_i32_128 = arith.constant 0 : i32
    %162 = tpu.memref_slice %arg5[%c12_i32_127, %c0_i32_128] : memref<16x128xf32, #tpu.memory_space<vmem>> -> memref<1x128xf32, #tpu.memory_space<vmem>>
    %163 = tpu.memref_slice %arg6[%c12_i32_124] : memref<16x!tpu.dma_semaphore, #tpu.memory_space<semaphore_mem>> -> memref<1x!tpu.dma_semaphore, #tpu.memory_space<semaphore_mem>>
    %164 = tpu.memref_squeeze %163 : memref<1x!tpu.dma_semaphore, #tpu.memory_space<semaphore_mem>> -> memref<!tpu.dma_semaphore, #tpu.memory_space<semaphore_mem>>
    tpu.wait_dma2 semaphore(%164 : memref<!tpu.dma_semaphore, #tpu.memory_space<semaphore_mem>>) src(%161 : memref<1x128xf32, #tpu.memory_space<any>>) dst(%162 : memref<1x128xf32, #tpu.memory_space<vmem>>)
    %c13_i32_129 = arith.constant 13 : i32
    %c0_i32_130 = arith.constant 0 : i32
    %c0_i32_131 = arith.constant 0 : i32
    %165 = tpu.memref_slice %arg3[%c0_i32_130, %c0_i32_131] : memref<64x128xf32, #tpu.memory_space<any>> -> memref<1x128xf32, #tpu.memory_space<any>>
    %c13_i32_132 = arith.constant 13 : i32
    %c0_i32_133 = arith.constant 0 : i32
    %166 = tpu.memref_slice %arg5[%c13_i32_132, %c0_i32_133] : memref<16x128xf32, #tpu.memory_space<vmem>> -> memref<1x128xf32, #tpu.memory_space<vmem>>
    %167 = tpu.memref_slice %arg6[%c13_i32_129] : memref<16x!tpu.dma_semaphore, #tpu.memory_space<semaphore_mem>> -> memref<1x!tpu.dma_semaphore, #tpu.memory_space<semaphore_mem>>
    %168 = tpu.memref_squeeze %167 : memref<1x!tpu.dma_semaphore, #tpu.memory_space<semaphore_mem>> -> memref<!tpu.dma_semaphore, #tpu.memory_space<semaphore_mem>>
    tpu.wait_dma2 semaphore(%168 : memref<!tpu.dma_semaphore, #tpu.memory_space<semaphore_mem>>) src(%165 : memref<1x128xf32, #tpu.memory_space<any>>) dst(%166 : memref<1x128xf32, #tpu.memory_space<vmem>>)
    %c14_i32_134 = arith.constant 14 : i32
    %c0_i32_135 = arith.constant 0 : i32
    %c0_i32_136 = arith.constant 0 : i32
    %169 = tpu.memref_slice %arg3[%c0_i32_135, %c0_i32_136] : memref<64x128xf32, #tpu.memory_space<any>> -> memref<1x128xf32, #tpu.memory_space<any>>
    %c14_i32_137 = arith.constant 14 : i32
    %c0_i32_138 = arith.constant 0 : i32
    %170 = tpu.memref_slice %arg5[%c14_i32_137, %c0_i32_138] : memref<16x128xf32, #tpu.memory_space<vmem>> -> memref<1x128xf32, #tpu.memory_space<vmem>>
    %171 = tpu.memref_slice %arg6[%c14_i32_134] : memref<16x!tpu.dma_semaphore, #tpu.memory_space<semaphore_mem>> -> memref<1x!tpu.dma_semaphore, #tpu.memory_space<semaphore_mem>>
    %172 = tpu.memref_squeeze %171 : memref<1x!tpu.dma_semaphore, #tpu.memory_space<semaphore_mem>> -> memref<!tpu.dma_semaphore, #tpu.memory_space<semaphore_mem>>
    tpu.wait_dma2 semaphore(%172 : memref<!tpu.dma_semaphore, #tpu.memory_space<semaphore_mem>>) src(%169 : memref<1x128xf32, #tpu.memory_space<any>>) dst(%170 : memref<1x128xf32, #tpu.memory_space<vmem>>)
    %c15_i32_139 = arith.constant 15 : i32
    %c0_i32_140 = arith.constant 0 : i32
    %c0_i32_141 = arith.constant 0 : i32
    %173 = tpu.memref_slice %arg3[%c0_i32_140, %c0_i32_141] : memref<64x128xf32, #tpu.memory_space<any>> -> memref<1x128xf32, #tpu.memory_space<any>>
    %c15_i32_142 = arith.constant 15 : i32
    %c0_i32_143 = arith.constant 0 : i32
    %174 = tpu.memref_slice %arg5[%c15_i32_142, %c0_i32_143] : memref<16x128xf32, #tpu.memory_space<vmem>> -> memref<1x128xf32, #tpu.memory_space<vmem>>
    %175 = tpu.memref_slice %arg6[%c15_i32_139] : memref<16x!tpu.dma_semaphore, #tpu.memory_space<semaphore_mem>> -> memref<1x!tpu.dma_semaphore, #tpu.memory_space<semaphore_mem>>
    %176 = tpu.memref_squeeze %175 : memref<1x!tpu.dma_semaphore, #tpu.memory_space<semaphore_mem>> -> memref<!tpu.dma_semaphore, #tpu.memory_space<semaphore_mem>>
    tpu.wait_dma2 semaphore(%176 : memref<!tpu.dma_semaphore, #tpu.memory_space<semaphore_mem>>) src(%173 : memref<1x128xf32, #tpu.memory_space<any>>) dst(%174 : memref<1x128xf32, #tpu.memory_space<vmem>>)
    %c0 = arith.constant 0 : index
    %c0_144 = arith.constant 0 : index
    %177 = vector.load %arg5[%c0, %c0_144] : memref<16x128xf32, #tpu.memory_space<vmem>>, vector<16x128xf32>
    %cst = arith.constant 5.65685415 : f32
    %178 = vector.broadcast %cst : f32 to vector<16x128xf32>
    %179 = arith.mulf %177, %178 : vector<16x128xf32>
    %c0_145 = arith.constant 0 : index
    %c0_146 = arith.constant 0 : index
    %180 = vector.load %arg2[%c0_145, %c0_146] : memref<16x128xf32, #tpu.memory_space<vmem>>, vector<16x128xf32>
    %181 = arith.addf %179, %180 : vector<16x128xf32>
    %c0_147 = arith.constant 0 : index
    %c0_148 = arith.constant 0 : index
    %182 = vector.load %arg4[%c0_147, %c0_148] : memref<16x128xf32, #tpu.memory_space<vmem>>, vector<16x128xf32>
    tpu.vector_store %arg4[%c0_147, %c0_148], %181 {strides = array<i32>} : memref<16x128xf32, #tpu.memory_space<vmem>>, vector<16x128xf32>,
    return
  }
  func.func @transform_0(%arg0: i32, %arg1: memref<16xi32, #tpu.memory_space<smem>>) -> (i32, i32) {
    %c0_i32 = arith.constant 0 : i32
    %c0_i32_0 = arith.constant 0 : i32
    return %arg0, %c0_i32 : i32, i32
  }
  func.func @transform_2(%arg0: i32, %arg1: memref<16xi32, #tpu.memory_space<smem>>) -> (i32, i32) {
    %c0_i32 = arith.constant 0 : i32
    %c0_i32_0 = arith.constant 0 : i32
    return %arg0, %c0_i32 : i32, i32
  }
}

</mosaic_0001>

<bundles_post_ra>
// kernel: tpu_custom_call.1
= control target key start
LH: loop header
LB: loop body
LE: loop exit
PB: predicated region body
PF: predicated region fallthrough
CT: control target
= control target key end

     0   :  { %s1380_s0 = inlined_call_operand.hbm [shape: s32[16], index: 0, kind: input, shape index: {}]   ;;  %s1381_s1 = inlined_call_operand.hbm [shape: f32[16,128], index: 1, kind: input, shape index: {}]   ;;  %s1382_s2 = inlined_call_operand.hbm [shape: f32[64,128], index: 2, kind: input, shape index: {}]   ;;  %s1383_s3 = inlined_call_operand.hbm [shape: f32[16,128], index: 3, kind: output, shape index: {}]  }
   0x1   :  { %s570_s14 = scalar_lea.hbm %s1380_s0, 16 }
   0x2   :  { %p571_p0 = scmp.ne.s32.totalorder %s1380_s0, %s570_s14  ;;  %p574_p1 = scmp.lt.u32.totalorder %s570_s14, %s1380_s0 }
   0x4   :  { %p576_p2 = pnand %p574_p1, %p571_p0 }
   0x6   :  { %579 = shalt.err (!%p576_p2)  }
   0x7   :  { %s1046_s19 = smov [#allocation5]  }
   0x8   :  { %9 = dma.hbm_to_smem %s1380_s0, 16, %s1046_s19, [#allocation4] }
   0x9   :  { %1008 = dma.done.wait [#allocation4], 16 }
   0xa   :  { %1009 = vsyncadd [#allocation4], 4294967280 }
   0xb   :  { %11 = sfence }
   0xc   :  { %12 = vsyncpa [#allocation7], 0 }
   0xd   :  { %13 = vsyncpa [#allocation8], 0  ;;  %s1047_s22 = smov [#allocation6]   ;;  %s580_s26 = scalar_lea.hbm %s1381_s1, 256 }
   0xe   :  { %s19_s23 = sshll.u32 %s1047_s22, 4  ;;  %p581_p3 = scmp.ne.s32.totalorder %s1381_s1, %s580_s26  ;;  %s20_s23 = int_to_ptr.vmem [resolvable:$true] %s19_s23 }
   0xf   :  { %p584_p4 = scmp.lt.u32.totalorder %s580_s26, %s1381_s1 }
  0x11   :  { %p586_p5 = pnand %p584_p4, %p581_p3 }
  0x13   :  { %589 = shalt.err (!%p586_p5)
}
  0x14   :  { %s590_s0 = scalar_lea.vmem %s20_s23, 256  ;;  %p595_p7 = scmp.lt.s32.totalorder %s20_s23, %s20_s23 }
  0x15   :  { %p591_p6 = scmp.ne.s32.totalorder %s20_s23, %s590_s0  ;;  %p596_p8 = scmp.lt.s32.totalorder %s590_s0, %s590_s0 }
  0x17   :  { %p597_p9 = por %p596_p8, %p595_p7 }
  0x19   :  { %p598_p10 = pnand %p597_p9, %p591_p6 }
  0x1b   :  { %601 = shalt.err (!%p598_p10)
}
  0x1c   :  { %s1048_s4 = smov 128   ;;  %s1049_s5 = smov 8  }
  0x1d   :  { %25 = dma.hbm_to_vmem [thread:$0]  %s1381_s1, 256, %s20_s23, [#allocation7], %s1048_s4, %s1048_s4, %s1049_s5  }
  0x1e   :  { %1010 = dma.done.wait [#allocation7], 256  }
  0x1f   :  { %1011 = vsyncadd [#allocation7], 4294967040  ;;  %s30_s8 = sld [smem:[#allocation5]]  ;;  %s1050_s9 = smov [#allocation2]  }
  0x20   :  { %s40_s10 = sshll.u32 %s1050_s9, 4  ;;  %s1116_s11 = sld [smem:[#allocation5 + $0x1]]  ;;  %s1114_s10 = int_to_ptr.vmem [resolvable:$true] %s40_s10 }
  0x21   :  { %s1051_s12 = smov [#allocation2 + $0x1]   ;;  %s1118_s14 = sld [smem:[#allocation5 + $0x2]] }
  0x22   :  { %s57_s13 = sshll.u32 %s1051_s12, 4  ;;  %s1052_s15 = smov [#allocation2 + $0x2]   ;;  %s1120_s13 = int_to_ptr.vmem [resolvable:$true] %s57_s13 }
  0x23   :  { %s74_s16 = sshll.u32 %s1052_s15, 4  ;;  %s1122_s17 = sld [smem:[#allocation5 + $0x3]]  ;;  %s1124_s16 = int_to_ptr.vmem [resolvable:$true] %s74_s16 }
  0x24   :  { %s1053_s18 = smov [#allocation2 + $0x3]   ;;  %s1135_s27 = scalar_lea.hbm %s1382_s2, 1024 }
  0x25   :  { %s502_s1 = sshll.u32 %s30_s8, 4  ;;  %s1126_s19 = sshll.u32 %s1053_s18, 4  ;;  %s92_s19 = int_to_ptr.vmem [resolvable:$true] %s1126_s19 }
  0x26   :  { %s32_s22 = scalar_lea.hbm %s1382_s2, %s502_s1  ;;  %s504_s23 = sshll.u32 %s1116_s11, 4 }
  0x27   :  { %s602_s24 = scalar_lea.hbm %s32_s22, 16  ;;  %p605_p12 = scmp.lt.u32.totalorder %s32_s22, %s1382_s2 }
  0x28   :  { %p603_p11 = scmp.ne.s32.totalorder %s32_s22, %s602_s24  ;;  %p606_p13 = scmp.lt.u32.totalorder %s1135_s27, %s602_s24 }
  0x29   :  { %p608_p1 = scmp.lt.u32.totalorder %s602_s24, %s32_s22 }
  0x2a   :  { %p607_p0 = por %p606_p13, %p605_p12 }
  0x2c   :  { %p609_p2 = por %p608_p1, %p607_p0 }
  0x2e   :  { %p610_p3 = pnand %p609_p2, %p603_p11 }
  0x30   :  { %613 = shalt.err (!%p610_p3)  }
  0x31   :  { %s614_s30 = scalar_lea.vmem %s1114_s10, 16  ;;  %s1144_s0 = scalar_lea.vmem %s1114_s10, 256 }
  0x32   :  { %p615_p4 = scmp.ne.s32.totalorder %s1114_s10, %s614_s30  ;;  %p619_p5 = scmp.lt.s32.totalorder %s1114_s10, %s1114_s10 }
  0x33   :  { %p620_p6 = scmp.lt.s32.totalorder %s1144_s0, %s614_s30 }
  0x35   :  { %p621_p7 = por %p620_p6, %p619_p5 }
  0x37   :  { %p622_p8 = pnand %p621_p7, %p615_p4 }
  0x39   :  { %625 = shalt.err (!%p622_p8)  }
  0x3a   :  { %43 = dma.hbm_to_vmem [thread:$0]  %s32_s22, 16, %s1114_s10, [#allocation3] }
  0x3b   :  { %s47_s8 = scalar_lea.hbm %s1382_s2, %s504_s23  ;;  %s506_s9 = sshll.u32 %s1118_s14, 4 }
  0x3c   :  { %s626_s11 = scalar_lea.hbm %s47_s8, 16  ;;  %p629_p10 = scmp.lt.u32.totalorder %s47_s8, %s1382_s2 }
  0x3d   :  { %p627_p9 = scmp.ne.s32.totalorder %s47_s8, %s626_s11  ;;  %p630_p11 = scmp.lt.u32.totalorder %s1135_s27, %s626_s11 }
  0x3e   :  { %p632_p13 = scmp.lt.u32.totalorder %s626_s11, %s47_s8 }
  0x3f   :  { %p631_p12 = por %p630_p11, %p629_p10 }
  0x41   :  { %p633_p0 = por %p632_p13, %p631_p12 }
  0x43   :  { %p634_p1 = pnand %p633_p0, %p627_p9 }
  0x45   :  { %637 = shalt.err (!%p634_p1)  }
  0x46   :  { %s638_s1 = scalar_lea.vmem %s1120_s13, 16  ;;  %p643_p3 = scmp.lt.s32.totalorder %s1120_s13, %s1114_s10 }
  0x47   :  { %p639_p2 = scmp.ne.s32.totalorder %s1120_s13, %s638_s1  ;;  %p644_p4 = scmp.lt.s32.totalorder %s1144_s0, %s638_s1 }
  0x49   :  { %p645_p5 = por %p644_p4, %p643_p3 }
  0x4b   :  { %p646_p6 = pnand %p645_p5, %p639_p2 }
  0x4d   :  { %649 = shalt.err (!%p646_p6)  }
  0x4e   :  { %60 = dma.hbm_to_vmem [thread:$0]  %s47_s8, 16, %s1120_s13, [#allocation3 + $0x1] }
  0x4f   :  { %s64_s20 = scalar_lea.hbm %s1382_s2, %s506_s9  ;;  %s508_s21 = sshll.u32 %s1122_s17, 4 }
  0x50   :  { %s650_s22 = scalar_lea.hbm %s64_s20, 16  ;;  %p653_p8 = scmp.lt.u32.totalorder %s64_s20, %s1382_s2 }
  0x51   :  { %p651_p7 = scmp.ne.s32.totalorder %s64_s20, %s650_s22  ;;  %p654_p9 = scmp.lt.u32.totalorder %s1135_s27, %s650_s22 }
  0x52   :  { %p656_p11 = scmp.lt.u32.totalorder %s650_s22, %s64_s20 }
  0x53   :  { %p655_p10 = por %p654_p9, %p653_p8 }
  0x55   :  { %p657_p12 = por %p656_p11, %p655_p10 }
  0x57   :  { %p658_p13 = pnand %p657_p12, %p651_p7 }
  0x59   :  { %661 = shalt.err (!%p658_p13)  }
  0x5a   :  { %s662_s13 = scalar_lea.vmem %s1124_s16, 16  ;;  %p667_p1 = scmp.lt.s32.totalorder %s1124_s16, %s1114_s10 }
  0x5b   :  { %p663_p0 = scmp.ne.s32.totalorder %s1124_s16, %s662_s13  ;;  %p668_p2 = scmp.lt.s32.totalorder %s1144_s0, %s662_s13 }
  0x5d   :  { %p669_p3 = por %p668_p2, %p667_p1 }
  0x5f   :  { %p670_p4 = pnand %p669_p3, %p663_p0 }
  0x61   :  { %673 = shalt.err (!%p670_p4)  }
  0x62   :  { %77 = dma.hbm_to_vmem [thread:$0]  %s64_s20, 16, %s1124_s16, [#allocation3 + $0x2] }
  0x63   :  { %s81_s26 = scalar_lea.hbm %s1382_s2, %s508_s21 }
  0x64   :  { %s674_s28 = scalar_lea.hbm %s81_s26, 16  ;;  %p677_p6 = scmp.lt.u32.totalorder %s81_s26, %s1382_s2 }
  0x65   :  { %p675_p5 = scmp.ne.s32.totalorder %s81_s26, %s674_s28  ;;  %p678_p7 = scmp.lt.u32.totalorder %s1135_s27, %s674_s28 }
  0x66   :  { %p680_p9 = scmp.lt.u32.totalorder %s674_s28, %s81_s26 }
  0x67   :  { %p679_p8 = por %p678_p7, %p677_p6 }
  0x69   :  { %p681_p10 = por %p680_p9, %p679_p8 }
  0x6b   :  { %p682_p11 = pnand %p681_p10, %p675_p5 }
  0x6d   :  { %685 = shalt.err (!%p682_p11)  }
  0x6e   :  { %s686_s6 = scalar_lea.vmem %s92_s19, 16  ;;  %p691_p13 = scmp.lt.s32.totalorder %s92_s19, %s1114_s10 }
  0x6f   :  { %p687_p12 = scmp.ne.s32.totalorder %s92_s19, %s686_s6  ;;  %p692_p0 = scmp.lt.s32.totalorder %s1144_s0, %s686_s6 }
  0x71   :  { %p693_p1 = por %p692_p0, %p691_p13 }
  0x73   :  { %p694_p2 = pnand %p693_p1, %p687_p12 }
  0x75   :  { %697 = shalt.err (!%p694_p2)  }
  0x76   :  { %94 = dma.hbm_to_vmem [thread:$0]  %s81_s26, 16, %s92_s19, [#allocation3 + $0x3] }
  0x77   :  { %s509_s16 = sld [smem:[#allocation5 + $0x4]]  ;;  %s1054_s7 = smov [#allocation2 + $0x4]  }
  0x78   :  { %s108_s8 = sshll.u32 %s1054_s7, 4  ;;  %s1188_s9 = sld [smem:[#allocation5 + $0x5]]  ;;  %s109_s8 = int_to_ptr.vmem [resolvable:$true] %s108_s8 }
  0x79   :  { %s1055_s11 = smov [#allocation2 + $0x5]   ;;  %s1190_s15 = sld [smem:[#allocation5 + $0x6]] }
  0x7a   :  { %s125_s12 = sshll.u32 %s1055_s11, 4  ;;  %s1056_s1 = smov [#allocation2 + $0x6]   ;;  %s1192_s12 = int_to_ptr.vmem [resolvable:$true] %s125_s12 }
  0x7b   :  { %s142_s14 = sshll.u32 %s1056_s1, 4  ;;  %s1194_s18 = sld [smem:[#allocation5 + $0x7]]  ;;  %s1196_s14 = int_to_ptr.vmem [resolvable:$true] %s142_s14 }
  0x7d   :  { %s510_s20 = sshll.u32 %s509_s16, 4 }
  0x7e   :  { %s98_s22 = scalar_lea.hbm %s1382_s2, %s510_s20  ;;  %s512_s23 = sshll.u32 %s1188_s9, 4 }
  0x7f   :  { %s698_s24 = scalar_lea.hbm %s98_s22, 16  ;;  %p701_p4 = scmp.lt.u32.totalorder %s98_s22, %s1382_s2 }
  0x80   :  { %p699_p3 = scmp.ne.s32.totalorder %s98_s22, %s698_s24  ;;  %p702_p5 = scmp.lt.u32.totalorder %s1135_s27, %s698_s24 }
  0x81   :  { %p704_p7 = scmp.lt.u32.totalorder %s698_s24, %s98_s22 }
  0x82   :  { %p703_p6 = por %p702_p5, %p701_p4 }
  0x84   :  { %p705_p8 = por %p704_p7, %p703_p6 }
  0x86   :  { %p706_p9 = pnand %p705_p8, %p699_p3 }
  0x88   :  { %709 = shalt.err (!%p706_p9)  }
  0x89   :  { %s710_s25 = scalar_lea.vmem %s109_s8, 16  ;;  %p715_p11 = scmp.lt.s32.totalorder %s109_s8, %s1114_s10 }
  0x8a   :  { %p711_p10 = scmp.ne.s32.totalorder %s109_s8, %s710_s25  ;;  %p716_p12 = scmp.lt.s32.totalorder %s1144_s0, %s710_s25 }
  0x8c   :  { %p717_p13 = por %p716_p12, %p715_p11 }
  0x8e   :  { %p718_p0 = pnand %p717_p13, %p711_p10 }
  0x90   :  { %721 = shalt.err (!%p718_p0)  }
  0x91   :  { %111 = dma.hbm_to_vmem [thread:$0]  %s98_s22, 16, %s109_s8, [#allocation3 + $0x4] }
  0x92   :  { %s115_s29 = scalar_lea.hbm %s1382_s2, %s512_s23  ;;  %s514_s30 = sshll.u32 %s1190_s15, 4 }
  0x93   :  { %s722_s6 = scalar_lea.hbm %s115_s29, 16  ;;  %p725_p2 = scmp.lt.u32.totalorder %s115_s29, %s1382_s2 }
  0x94   :  { %p723_p1 = scmp.ne.s32.totalorder %s115_s29, %s722_s6  ;;  %p726_p3 = scmp.lt.u32.totalorder %s1135_s27, %s722_s6 }
  0x95   :  { %p728_p5 = scmp.lt.u32.totalorder %s722_s6, %s115_s29 }
  0x96   :  { %p727_p4 = por %p726_p3, %p725_p2 }
  0x98   :  { %p729_p6 = por %p728_p5, %p727_p4 }
  0x9a   :  { %p730_p7 = pnand %p729_p6, %p723_p1 }
  0x9c   :  { %733 = shalt.err (!%p730_p7)  }
  0x9d   :  { %s734_s8 = scalar_lea.vmem %s1192_s12, 16  ;;  %p739_p9 = scmp.lt.s32.totalorder %s1192_s12, %s1114_s10 }
  0x9e   :  { %p735_p8 = scmp.ne.s32.totalorder %s1192_s12, %s734_s8  ;;  %p740_p10 = scmp.lt.s32.totalorder %s1144_s0, %s734_s8 }
  0xa0   :  { %p741_p11 = por %p740_p10, %p739_p9 }
  0xa2   :  { %p742_p12 = pnand %p741_p11, %p735_p8 }
  0xa4   :  { %745 = shalt.err (!%p742_p12)  }
  0xa5   :  { %128 = dma.hbm_to_vmem [thread:$0]  %s115_s29, 16, %s1192_s12, [#allocation3 + $0x5] }
  0xa6   :  { %s132_s15 = scalar_lea.hbm %s1382_s2, %s514_s30  ;;  %s516_s1 = sshll.u32 %s1194_s18, 4 }
  0xa7   :  { %s746_s20 = scalar_lea.hbm %s132_s15, 16  ;;  %p749_p0 = scmp.lt.u32.totalorder %s132_s15, %s1382_s2 }
  0xa8   :  { %p747_p13 = scmp.ne.s32.totalorder %s132_s15, %s746_s20  ;;  %p750_p1 = scmp.lt.u32.totalorder %s1135_s27, %s746_s20 }
  0xa9   :  { %p752_p3 = scmp.lt.u32.totalorder %s746_s20, %s132_s15 }
  0xaa   :  { %p751_p2 = por %p750_p1, %p749_p0 }
  0xac   :  { %p753_p4 = por %p752_p3, %p751_p2 }
  0xae   :  { %p754_p5 = pnand %p753_p4, %p747_p13 }
  0xb0   :  { %757 = shalt.err (!%p754_p5)  }
  0xb1   :  { %s758_s12 = scalar_lea.vmem %s1196_s14, 16  ;;  %p763_p7 = scmp.lt.s32.totalorder %s1196_s14, %s1114_s10 }
  0xb2   :  { %p759_p6 = scmp.ne.s32.totalorder %s1196_s14, %s758_s12  ;;  %p764_p8 = scmp.lt.s32.totalorder %s1144_s0, %s758_s12 }
  0xb4   :  { %p765_p9 = por %p764_p8, %p763_p7 }
  0xb6   :  { %p766_p10 = pnand %p765_p9, %p759_p6 }
  0xb8   :  { %769 = shalt.err (!%p766_p10)  }
  0xb9   :  { %145 = dma.hbm_to_vmem [thread:$0]  %s132_s15, 16, %s1196_s14, [#allocation3 + $0x6] }
  0xba   :  { %s149_s23 = scalar_lea.hbm %s1382_s2, %s516_s1  ;;  %s1057_s24 = smov [#allocation2 + $0x7]  }
  0xbb   :  { %s159_s13 = sshll.u32 %s1057_s24, 4  ;;  %s1239_s17 = sld [smem:[#allocation5 + $0x8]]  ;;  %s160_s13 = int_to_ptr.vmem [resolvable:$true] %s159_s13 }
  0xbc   :  { %s770_s25 = scalar_lea.hbm %s149_s23, 16  ;;  %p773_p12 = scmp.lt.u32.totalorder %s149_s23, %s1382_s2 }
  0xbd   :  { %p771_p11 = scmp.ne.s32.totalorder %s149_s23, %s770_s25  ;;  %p774_p13 = scmp.lt.u32.totalorder %s1135_s27, %s770_s25 }
  0xbe   :  { %p776_p1 = scmp.lt.u32.totalorder %s770_s25, %s149_s23 }
  0xbf   :  { %p775_p0 = por %p774_p13, %p773_p12 }
  0xc1   :  { %p777_p2 = por %p776_p1, %p775_p0 }
  0xc3   :  { %p778_p3 = pnand %p777_p2, %p771_p11 }
  0xc5   :  { %781 = shalt.err (!%p778_p3)  }
  0xc6   :  { %s782_s14 = scalar_lea.vmem %s160_s13, 16  ;;  %p787_p5 = scmp.lt.s32.totalorder %s160_s13, %s1114_s10 }
  0xc7   :  { %p783_p4 = scmp.ne.s32.totalorder %s160_s13, %s782_s14  ;;  %p788_p6 = scmp.lt.s32.totalorder %s1144_s0, %s782_s14 }
  0xc9   :  { %p789_p7 = por %p788_p6, %p787_p5 }
  0xcb   :  { %p790_p8 = pnand %p789_p7, %p783_p4 }
  0xcd   :  { %793 = shalt.err (!%p790_p8)  }
  0xce   :  { %162 = dma.hbm_to_vmem [thread:$0]  %s149_s23, 16, %s160_s13, [#allocation3 + $0x7] }
  0xcf   :  { %s1058_s29 = smov [#allocation2 + $0x8]   ;;  %s1247_s6 = sld [smem:[#allocation5 + $0x9]] }
  0xd0   :  { %s176_s30 = sshll.u32 %s1058_s29, 4  ;;  %s1059_s16 = smov [#allocation2 + $0x9]   ;;  %s177_s30 = int_to_ptr.vmem [resolvable:$true] %s176_s30 }
  0xd1   :  { %s193_s7 = sshll.u32 %s1059_s16, 4  ;;  %s1249_s8 = sld [smem:[#allocation5 + $0xa]]  ;;  %s1252_s7 = int_to_ptr.vmem [resolvable:$true] %s193_s7 }
  0xd2   :  { %s518_s9 = sshll.u32 %s1239_s17, 4 }
  0xd3   :  { %s166_s1 = scalar_lea.hbm %s1382_s2, %s518_s9 }
  0xd4   :  { %s794_s20 = scalar_lea.hbm %s166_s1, 16  ;;  %p797_p10 = scmp.lt.u32.totalorder %s166_s1, %s1382_s2 }
  0xd5   :  { %p795_p9 = scmp.ne.s32.totalorder %s166_s1, %s794_s20  ;;  %p798_p11 = scmp.lt.u32.totalorder %s1135_s27, %s794_s20 }
  0xd6   :  { %p800_p13 = scmp.lt.u32.totalorder %s794_s20, %s166_s1 }
  0xd7   :  { %p799_p12 = por %p798_p11, %p797_p10 }
  0xd9   :  { %p801_p0 = por %p800_p13, %p799_p12 }
  0xdb   :  { %p802_p1 = pnand %p801_p0, %p795_p9 }
  0xdd   :  { %805 = shalt.err (!%p802_p1)  }
  0xde   :  { %s806_s12 = scalar_lea.vmem %s177_s30, 16  ;;  %p811_p3 = scmp.lt.s32.totalorder %s177_s30, %s1114_s10 }
  0xdf   :  { %p807_p2 = scmp.ne.s32.totalorder %s177_s30, %s806_s12  ;;  %p812_p4 = scmp.lt.s32.totalorder %s1144_s0, %s806_s12 }
  0xe1   :  { %p813_p5 = por %p812_p4, %p811_p3 }
  0xe3   :  { %p814_p6 = pnand %p813_p5, %p807_p2 }
  0xe5   :  { %817 = shalt.err (!%p814_p6)  }
  0xe6   :  { %179 = dma.hbm_to_vmem [thread:$0]  %s166_s1, 16, %s177_s30, [#allocation3 + $0x8] }
  0xe7   :  { %s520_s18 = sshll.u32 %s1247_s6, 4  ;;  %s1060_s22 = smov [#allocation2 + $0xa]  }
  0xe8   :  { %s210_s23 = sshll.u32 %s1060_s22, 4  ;;  %s183_s17 = scalar_lea.hbm %s1382_s2, %s520_s18  ;;  %s1267_s23 = int_to_ptr.vmem [resolvable:$true] %s210_s23 }
  0xe9   :  { %s818_s25 = scalar_lea.hbm %s183_s17, 16  ;;  %p821_p8 = scmp.lt.u32.totalorder %s183_s17, %s1382_s2 }
  0xea   :  { %p819_p7 = scmp.ne.s32.totalorder %s183_s17, %s818_s25  ;;  %p822_p9 = scmp.lt.u32.totalorder %s1135_s27, %s818_s25 }
  0xeb   :  { %p824_p11 = scmp.lt.u32.totalorder %s818_s25, %s183_s17 }
  0xec   :  { %p823_p10 = por %p822_p9, %p821_p8 }
  0xee   :  { %p825_p12 = por %p824_p11, %p823_p10 }
  0xf0   :  { %p826_p13 = pnand %p825_p12, %p819_p7 }
  0xf2   :  { %829 = shalt.err (!%p826_p13)  }
  0xf3   :  { %s830_s14 = scalar_lea.vmem %s1252_s7, 16  ;;  %p835_p1 = scmp.lt.s32.totalorder %s1252_s7, %s1114_s10 }
  0xf4   :  { %p831_p0 = scmp.ne.s32.totalorder %s1252_s7, %s830_s14  ;;  %p836_p2 = scmp.lt.s32.totalorder %s1144_s0, %s830_s14 }
  0xf6   :  { %p837_p3 = por %p836_p2, %p835_p1 }
  0xf8   :  { %p838_p4 = pnand %p837_p3, %p831_p0 }
  0xfa   :  { %841 = shalt.err (!%p838_p4)  }
  0xfb   :  { %196 = dma.hbm_to_vmem [thread:$0]  %s183_s17, 16, %s1252_s7, [#allocation3 + $0x9] }
  0xfc   :  { %s522_s29 = sshll.u32 %s1249_s8, 4  ;;  %s1280_s30 = sld [smem:[#allocation5 + $0xb]] }
  0xfd   :  { %s200_s9 = scalar_lea.hbm %s1382_s2, %s522_s29 }
  0xfe   :  { %s842_s11 = scalar_lea.hbm %s200_s9, 16  ;;  %p845_p6 = scmp.lt.u32.totalorder %s200_s9, %s1382_s2 }
  0xff   :  { %p843_p5 = scmp.ne.s32.totalorder %s200_s9, %s842_s11  ;;  %p846_p7 = scmp.lt.u32.totalorder %s1135_s27, %s842_s11 }
 0x100   :  { %p848_p9 = scmp.lt.u32.totalorder %s842_s11, %s200_s9 }
 0x101   :  { %p847_p8 = por %p846_p7, %p845_p6 }
 0x103   :  { %p849_p10 = por %p848_p9, %p847_p8 }
 0x105   :  { %p850_p11 = pnand %p849_p10, %p843_p5 }
 0x107   :  { %853 = shalt.err (!%p850_p11)  }
 0x108   :  { %s854_s7 = scalar_lea.vmem %s1267_s23, 16  ;;  %p859_p13 = scmp.lt.s32.totalorder %s1267_s23, %s1114_s10 }
 0x109   :  { %p855_p12 = scmp.ne.s32.totalorder %s1267_s23, %s854_s7  ;;  %p860_p0 = scmp.lt.s32.totalorder %s1144_s0, %s854_s7 }
 0x10b   :  { %p861_p1 = por %p860_p0, %p859_p13 }
 0x10d   :  { %p862_p2 = pnand %p861_p1, %p855_p12 }
 0x10f   :  { %865 = shalt.err (!%p862_p2)  }
 0x110   :  { %213 = dma.hbm_to_vmem [thread:$0]  %s200_s9, 16, %s1267_s23, [#allocation3 + $0xa] }
 0x111   :  { %s1061_s8 = smov [#allocation2 + $0xb]   ;;  %s1295_s19 = sld [smem:[#allocation5 + $0xc]] }
 0x112   :  { %s227_s20 = sshll.u32 %s1061_s8, 4  ;;  %s1062_s21 = smov [#allocation2 + $0xc]   ;;  %s228_s20 = int_to_ptr.vmem [resolvable:$true] %s227_s20 }
 0x113   :  { %s244_s12 = sshll.u32 %s1062_s21, 4  ;;  %s1297_s18 = sld [smem:[#allocation5 + $0xd]]  ;;  %s1300_s12 = int_to_ptr.vmem [resolvable:$true] %s244_s12 }
 0x114   :  { %s524_s22 = sshll.u32 %s1280_s30, 4 }
 0x115   :  { %s217_s17 = scalar_lea.hbm %s1382_s2, %s524_s22 }
 0x116   :  { %s866_s25 = scalar_lea.hbm %s217_s17, 16  ;;  %p869_p4 = scmp.lt.u32.totalorder %s217_s17, %s1382_s2 }
 0x117   :  { %p867_p3 = scmp.ne.s32.totalorder %s217_s17, %s866_s25  ;;  %p870_p5 = scmp.lt.u32.totalorder %s1135_s27, %s866_s25 }
 0x118   :  { %p872_p7 = scmp.lt.u32.totalorder %s866_s25, %s217_s17 }
 0x119   :  { %p871_p6 = por %p870_p5, %p869_p4 }
 0x11b   :  { %p873_p8 = por %p872_p7, %p871_p6 }
 0x11d   :  { %p874_p9 = pnand %p873_p8, %p867_p3 }
 0x11f   :  { %877 = shalt.err (!%p874_p9)  }
 0x120   :  { %s878_s28 = scalar_lea.vmem %s228_s20, 16  ;;  %p883_p11 = scmp.lt.s32.totalorder %s228_s20, %s1114_s10 }
 0x121   :  { %p879_p10 = scmp.ne.s32.totalorder %s228_s20, %s878_s28  ;;  %p884_p12 = scmp.lt.s32.totalorder %s1144_s0, %s878_s28 }
 0x123   :  { %p885_p13 = por %p884_p12, %p883_p11 }
 0x125   :  { %p886_p0 = pnand %p885_p13, %p879_p10 }
 0x127   :  { %889 = shalt.err (!%p886_p0)  }
 0x128   :  { %230 = dma.hbm_to_vmem [thread:$0]  %s217_s17, 16, %s228_s20, [#allocation3 + $0xb] }
 0x129   :  { %s526_s14 = sshll.u32 %s1295_s19, 4  ;;  %s1063_s29 = smov [#allocation2 + $0xd]  }
 0x12a   :  { %s261_s30 = sshll.u32 %s1063_s29, 4  ;;  %s234_s9 = scalar_lea.hbm %s1382_s2, %s526_s14  ;;  %s1315_s30 = int_to_ptr.vmem [resolvable:$true] %s261_s30 }
 0x12b   :  { %s890_s11 = scalar_lea.hbm %s234_s9, 16  ;;  %p893_p2 = scmp.lt.u32.totalorder %s234_s9, %s1382_s2 }
 0x12c   :  { %p891_p1 = scmp.ne.s32.totalorder %s234_s9, %s890_s11  ;;  %p894_p3 = scmp.lt.u32.totalorder %s1135_s27, %s890_s11 }
 0x12d   :  { %p896_p5 = scmp.lt.u32.totalorder %s890_s11, %s234_s9 }
 0x12e   :  { %p895_p4 = por %p894_p3, %p893_p2 }
 0x130   :  { %p897_p6 = por %p896_p5, %p895_p4 }
 0x132   :  { %p898_p7 = pnand %p897_p6, %p891_p1 }
 0x134   :  { %901 = shalt.err (!%p898_p7)  }
 0x135   :  { %s902_s7 = scalar_lea.vmem %s1300_s12, 16  ;;  %p907_p9 = scmp.lt.s32.totalorder %s1300_s12, %s1114_s10 }
 0x136   :  { %p903_p8 = scmp.ne.s32.totalorder %s1300_s12, %s902_s7  ;;  %p908_p10 = scmp.lt.s32.totalorder %s1144_s0, %s902_s7 }
 0x138   :  { %p909_p11 = por %p908_p10, %p907_p9 }
 0x13a   :  { %p910_p12 = pnand %p909_p11, %p903_p8 }
 0x13c   :  { %913 = shalt.err (!%p910_p12)  }
 0x13d   :  { %247 = dma.hbm_to_vmem [thread:$0]  %s234_s9, 16, %s1300_s12, [#allocation3 + $0xc] }
 0x13e   :  { %s528_s8 = sshll.u32 %s1297_s18, 4  ;;  %s529_s20 = sld [smem:[#allocation5 + $0xe]] }
 0x13f   :  { %s251_s22 = scalar_lea.hbm %s1382_s2, %s528_s8 }
 0x140   :  { %s914_s24 = scalar_lea.hbm %s251_s22, 16  ;;  %p917_p0 = scmp.lt.u32.totalorder %s251_s22, %s1382_s2 }
 0x141   :  { %p915_p13 = scmp.ne.s32.totalorder %s251_s22, %s914_s24  ;;  %p918_p1 = scmp.lt.u32.totalorder %s1135_s27, %s914_s24 }
 0x142   :  { %p920_p3 = scmp.lt.u32.totalorder %s914_s24, %s251_s22 }
 0x143   :  { %p919_p2 = por %p918_p1, %p917_p0 }
 0x145   :  { %p921_p4 = por %p920_p3, %p919_p2 }
 0x147   :  { %p922_p5 = pnand %p921_p4, %p915_p13 }
 0x149   :  { %925 = shalt.err (!%p922_p5)  }
 0x14a   :  { %s926_s12 = scalar_lea.vmem %s1315_s30, 16  ;;  %p931_p7 = scmp.lt.s32.totalorder %s1315_s30, %s1114_s10 }
 0x14b   :  { %p927_p6 = scmp.ne.s32.totalorder %s1315_s30, %s926_s12  ;;  %p932_p8 = scmp.lt.s32.totalorder %s1144_s0, %s926_s12 }
 0x14d   :  { %p933_p9 = por %p932_p8, %p931_p7 }
 0x14f   :  { %p934_p10 = pnand %p933_p9, %p927_p6 }
 0x151   :  { %937 = shalt.err (!%p934_p10)  }
 0x152   :  { %264 = dma.hbm_to_vmem [thread:$0]  %s251_s22, 16, %s1315_s30, [#allocation3 + $0xd] }
 0x153   :  { %s1064_s18 = smov [#allocation2 + $0xe]   ;;  %s531_s26 = sld [smem:[#allocation5 + $0xf]] }
 0x154   :  { %s278_s25 = sshll.u32 %s1064_s18, 4  ;;  %s1065_s23 = smov [#allocation2 + $0xf]   ;;  %s279_s25 = int_to_ptr.vmem [resolvable:$true] %s278_s25 }
 0x155   :  { %s295_s28 = sshll.u32 %s1065_s23, 4  ;;  %s530_s14 = sshll.u32 %s529_s20, 4  ;;  %s1344_s28 = int_to_ptr.vmem [resolvable:$true] %s295_s28 }
 0x156   :  { %s268_s16 = scalar_lea.hbm %s1382_s2, %s530_s14 }
 0x157   :  { %s938_s9 = scalar_lea.hbm %s268_s16, 16  ;;  %p941_p12 = scmp.lt.u32.totalorder %s268_s16, %s1382_s2 }
 0x158   :  { %p939_p11 = scmp.ne.s32.totalorder %s268_s16, %s938_s9  ;;  %p942_p13 = scmp.lt.u32.totalorder %s1135_s27, %s938_s9 }
 0x159   :  { %p944_p1 = scmp.lt.u32.totalorder %s938_s9, %s268_s16 }
 0x15a   :  { %p943_p0 = por %p942_p13, %p941_p12 }
 0x15c   :  { %p945_p2 = por %p944_p1, %p943_p0 }
 0x15e   :  { %p946_p3 = pnand %p945_p2, %p939_p11 }
 0x160   :  { %949 = shalt.err (!%p946_p3)  }
 0x161   :  { %s950_s30 = scalar_lea.vmem %s279_s25, 16  ;;  %p955_p5 = scmp.lt.s32.totalorder %s279_s25, %s1114_s10 }
 0x162   :  { %p951_p4 = scmp.ne.s32.totalorder %s279_s25, %s950_s30  ;;  %p956_p6 = scmp.lt.s32.totalorder %s1144_s0, %s950_s30 }
 0x164   :  { %p957_p7 = por %p956_p6, %p955_p5 }
 0x166   :  { %p958_p8 = pnand %p957_p7, %p951_p4 }
 0x168   :  { %961 = shalt.err (!%p958_p8)  }
 0x169   :  { %281 = dma.hbm_to_vmem [thread:$0]  %s268_s16, 16, %s279_s25, [#allocation3 + $0xe] }
 0x16a   :  { %s532_s1 = sshll.u32 %s531_s26, 4 }
 0x16b   :  { %s285_s20 = scalar_lea.hbm %s1382_s2, %s532_s1 }
 0x16c   :  { %s962_s19 = scalar_lea.hbm %s285_s20, 16  ;;  %p965_p10 = scmp.lt.u32.totalorder %s285_s20, %s1382_s2 }
 0x16d   :  { %p963_p9 = scmp.ne.s32.totalorder %s285_s20, %s962_s19  ;;  %p966_p11 = scmp.lt.u32.totalorder %s1135_s27, %s962_s19 }
 0x16e   :  { %p968_p13 = scmp.lt.u32.totalorder %s962_s19, %s285_s20 }
 0x16f   :  { %p967_p12 = por %p966_p11, %p965_p10 }
 0x171   :  { %p969_p0 = por %p968_p13, %p967_p12 }
 0x173   :  { %p970_p1 = pnand %p969_p0, %p963_p9 }
 0x175   :  { %973 = shalt.err (!%p970_p1)  }
 0x176   :  { %s974_s24 = scalar_lea.vmem %s1344_s28, 16  ;;  %p979_p3 = scmp.lt.s32.totalorder %s1344_s28, %s1114_s10 }
 0x177   :  { %p975_p2 = scmp.ne.s32.totalorder %s1344_s28, %s974_s24  ;;  %p980_p4 = scmp.lt.s32.totalorder %s1144_s0, %s974_s24 }
 0x179   :  { %p981_p5 = por %p980_p4, %p979_p3 }
 0x17b   :  { %p982_p6 = pnand %p981_p5, %p975_p2 }
 0x17d   :  { %985 = shalt.err (!%p982_p6)  }
 0x17e   :  { %298 = dma.hbm_to_vmem [thread:$0]  %s285_s20, 16, %s1344_s28, [#allocation3 + $0xf] }
 0x17f   :  { %1012 = dma.done.wait [#allocation3], 16 }
 0x180   :  { %1013 = vsyncadd [#allocation3], 4294967280 }
 0x181   :  { %1014 = dma.done.wait [#allocation3 + $0x1], 16 }
 0x182   :  { %1015 = vsyncadd [#allocation3 + $0x1], 4294967280 }
 0x183   :  { %1016 = dma.done.wait [#allocation3 + $0x2], 16 }
 0x184   :  { %1017 = vsyncadd [#allocation3 + $0x2], 4294967280 }
 0x185   :  { %1018 = dma.done.wait [#allocation3 + $0x3], 16 }
 0x186   :  { %1019 = vsyncadd [#allocation3 + $0x3], 4294967280 }
 0x187   :  { %1020 = dma.done.wait [#allocation3 + $0x4], 16 }
 0x188   :  { %1021 = vsyncadd [#allocation3 + $0x4], 4294967280 }
 0x189   :  { %1022 = dma.done.wait [#allocation3 + $0x5], 16 }
 0x18a   :  { %1023 = vsyncadd [#allocation3 + $0x5], 4294967280 }
 0x18b   :  { %1024 = dma.done.wait [#allocation3 + $0x6], 16 }
 0x18c   :  { %1025 = vsyncadd [#allocation3 + $0x6], 4294967280 }
 0x18d   :  { %1026 = dma.done.wait [#allocation3 + $0x7], 16 }
 0x18e   :  { %1027 = vsyncadd [#allocation3 + $0x7], 4294967280 }
 0x18f   :  { %1028 = dma.done.wait [#allocation3 + $0x8], 16 }
 0x190   :  { %1029 = vsyncadd [#allocation3 + $0x8], 4294967280 }
 0x191   :  { %1030 = dma.done.wait [#allocation3 + $0x9], 16 }
 0x192   :  { %1031 = vsyncadd [#allocation3 + $0x9], 4294967280 }
 0x193   :  { %1032 = dma.done.wait [#allocation3 + $0xa], 16 }
 0x194   :  { %1033 = vsyncadd [#allocation3 + $0xa], 4294967280 }
 0x195   :  { %1034 = dma.done.wait [#allocation3 + $0xb], 16 }
 0x196   :  { %1035 = vsyncadd [#allocation3 + $0xb], 4294967280 }
 0x197   :  { %1036 = dma.done.wait [#allocation3 + $0xc], 16 }
 0x198   :  { %1037 = vsyncadd [#allocation3 + $0xc], 4294967280 }
 0x199   :  { %1038 = dma.done.wait [#allocation3 + $0xd], 16 }
 0x19a   :  { %1039 = vsyncadd [#allocation3 + $0xd], 4294967280 }
 0x19b   :  { %1040 = dma.done.wait [#allocation3 + $0xe], 16 }
 0x19c   :  { %1041 = vsyncadd [#allocation3 + $0xe], 4294967280 }
 0x19d   :  { %1042 = dma.done.wait [#allocation3 + $0xf], 16 }
 0x19e   :  { %1043 = vsyncadd [#allocation3 + $0xf], 4294967280  ;;  %v332_v0 = vld [vmem:[#allocation2] sm:$0xff]  ;;  %v336_v1 = vld [vmem:[#allocation6] sm:$0xff]  ;;  %s1066_s2 = smov [#allocation9]  }
 0x19f   :  { %v333_v2 = vld [vmem:[#allocation2 + $0x8] sm:$0xff]  ;;  %s347_s10 = sshll.u32 %s1066_s2, 4  ;;  %v334_v3 = vmul.f32 5.656854, %v332_v0  ;;  %v337_v5 = vld [vmem:[#allocation6 + $0x8] sm:$0xff]  ;;  %s348_s10 = int_to_ptr.vmem [resolvable:$true] %s347_s10 }
 0x1a0   :  { %v335_v4 = vmul.f32 5.656854, %v333_v2  ;;  %s986_s27 = scalar_lea.vmem %s348_s10, 256  ;;  %p991_p8 = scmp.lt.s32.totalorder %s348_s10, %s348_s10 }
 0x1a1   :  { %v338_v6 = vadd.f32 %v336_v1, %v334_v3  ;;  %p987_p7 = scmp.ne.s32.totalorder %s348_s10, %s986_s27  ;;  %p992_p9 = scmp.lt.s32.totalorder %s986_s27, %s986_s27 }
 0x1a2   :  { %v339_v7 = vadd.f32 %v337_v5, %v335_v4 }
 0x1a3   :  { %340 = vst [vmem:[#allocation9] sm:$0xff] %v338_v6  ;;  %p993_p10 = por %p992_p9, %p991_p8 }
 0x1a4   :  { %341 = vst [vmem:[#allocation9 + $0x8] sm:$0xff] %v339_v7 }
 0x1a5   :  { %p994_p11 = pnand %p993_p10, %p987_p7 }
 0x1a7   :  { %997 = shalt.err (!%p994_p11)
}
 0x1a8   :  { %s998_s17 = scalar_lea.hbm %s1383_s3, 256 }
 0x1a9   :  { %p999_p12 = scmp.ne.s32.totalorder %s1383_s3, %s998_s17  ;;  %p1002_p13 = scmp.lt.u32.totalorder %s998_s17, %s1383_s3 }
 0x1ab   :  { %p1004_p0 = pnand %p1002_p13, %p999_p12 }
 0x1ad   :  { %1007 = shalt.err (!%p1004_p0)
}
 0x1ae   :  { %353 = dma.vmem_to_hbm [thread:$0]  %s348_s10, 256, %s1383_s3, [#allocation8], %s1048_s4, %s1048_s4, %s1049_s5  }
 0x1af   :  { %1044 = dma.done.wait [#allocation8], 256  }
 0x1b0   :  { %1045 = vsyncadd [#allocation8], 4294967040 }
 0x1b1   :  { %357 = vsyncpa [#allocation7], 1 }
 0x1b2   :  { %358 = vsyncpa [#allocation8], 1 }
 0x1b3   :  { %359 = vsyncmov [#allocation3] }
 0x1b6   :  { %s360_s14 = vpop.sfrf %359 }
 0x1b7   :  { %p533_p1 = scmp.ne.s32.totalorder %s360_s14, 0 }
 0x1b9   :  { %364 = shalt.err (%p533_p1)  }
 0x1ba   :  { %366 = vsyncmov [#allocation3 + $0x1] }
 0x1bd   :  { %s367_s29 = vpop.sfrf %366 }
 0x1be   :  { %p534_p2 = scmp.ne.s32.totalorder %s367_s29, 0 }
 0x1c0   :  { %371 = shalt.err (%p534_p2)  }
 0x1c1   :  { %373 = vsyncmov [#allocation3 + $0x2] }
 0x1c4   :  { %s374_s6 = vpop.sfrf %373 }
 0x1c5   :  { %p535_p3 = scmp.ne.s32.totalorder %s374_s6, 0 }
 0x1c7   :  { %378 = shalt.err (%p535_p3)  }
 0x1c8   :  { %380 = vsyncmov [#allocation3 + $0x3] }
 0x1cb   :  { %s381_s16 = vpop.sfrf %380 }
 0x1cc   :  { %p536_p4 = scmp.ne.s32.totalorder %s381_s16, 0 }
 0x1ce   :  { %385 = shalt.err (%p536_p4)  }
 0x1cf   :  { %387 = vsyncmov [#allocation3 + $0x4] }
 0x1d2   :  { %s388_s3 = vpop.sfrf %387 }
 0x1d3   :  { %p537_p5 = scmp.ne.s32.totalorder %s388_s3, 0 }
 0x1d5   :  { %392 = shalt.err (%p537_p5)  }
 0x1d6   :  { %394 = vsyncmov [#allocation3 + $0x5] }
 0x1d9   :  { %s395_s4 = vpop.sfrf %394 }
 0x1da   :  { %p538_p6 = scmp.ne.s32.totalorder %s395_s4, 0 }
 0x1dc   :  { %399 = shalt.err (%p538_p6)  }
 0x1dd   :  { %401 = vsyncmov [#allocation3 + $0x6] }
 0x1e0   :  { %s402_s5 = vpop.sfrf %401 }
 0x1e1   :  { %p539_p7 = scmp.ne.s32.totalorder %s402_s5, 0 }
 0x1e3   :  { %406 = shalt.err (%p539_p7)  }
 0x1e4   :  { %408 = vsyncmov [#allocation3 + $0x7] }
 0x1e7   :  { %s409_s9 = vpop.sfrf %408 }
 0x1e8   :  { %p540_p8 = scmp.ne.s32.totalorder %s409_s9, 0 }
 0x1ea   :  { %413 = shalt.err (%p540_p8)  }
 0x1eb   :  { %415 = vsyncmov [#allocation3 + $0x8] }
 0x1ee   :  { %s416_s11 = vpop.sfrf %415 }
 0x1ef   :  { %p541_p9 = scmp.ne.s32.totalorder %s416_s11, 0 }
 0x1f1   :  { %420 = shalt.err (%p541_p9)  }
 0x1f2   :  { %422 = vsyncmov [#allocation3 + $0x9] }
 0x1f5   :  { %s423_s15 = vpop.sfrf %422 }
 0x1f6   :  { %p542_p10 = scmp.ne.s32.totalorder %s423_s15, 0 }
 0x1f8   :  { %427 = shalt.err (%p542_p10)  }
 0x1f9   :  { %429 = vsyncmov [#allocation3 + $0xa] }
 0x1fc   :  { %s430_s30 = vpop.sfrf %429 }
 0x1fd   :  { %p543_p11 = scmp.ne.s32.totalorder %s430_s30, 0 }
 0x1ff   :  { %434 = shalt.err (%p543_p11)  }
 0x200   :  { %436 = vsyncmov [#allocation3 + $0xb] }
 0x203   :  { %s437_s1 = vpop.sfrf %436 }
 0x204   :  { %p544_p12 = scmp.ne.s32.totalorder %s437_s1, 0 }
 0x206   :  { %441 = shalt.err (%p544_p12)  }
 0x207   :  { %443 = vsyncmov [#allocation3 + $0xc] }
 0x20a   :  { %s444_s7 = vpop.sfrf %443 }
 0x20b   :  { %p545_p13 = scmp.ne.s32.totalorder %s444_s7, 0 }
 0x20d   :  { %448 = shalt.err (%p545_p13)  }
 0x20e   :  { %450 = vsyncmov [#allocation3 + $0xd] }
 0x211   :  { %s451_s8 = vpop.sfrf %450 }
 0x212   :  { %p546_p0 = scmp.ne.s32.totalorder %s451_s8, 0 }
 0x214   :  { %455 = shalt.err (%p546_p0)  }
 0x215   :  { %457 = vsyncmov [#allocation3 + $0xe] }
 0x218   :  { %s458_s20 = vpop.sfrf %457 }
 0x219   :  { %p547_p1 = scmp.ne.s32.totalorder %s458_s20, 0 }
 0x21b   :  { %462 = shalt.err (%p547_p1)  }
 0x21c   :  { %464 = vsyncmov [#allocation3 + $0xf] }
 0x21f   :  { %s465_s19 = vpop.sfrf %464 }
 0x220   :  { %p548_p2 = scmp.ne.s32.totalorder %s465_s19, 0 }
 0x222   :  { %469 = shalt.err (%p548_p2)  }

</bundles_post_ra>
